<compile_context>
chip_gen: v6e
topology: v6e:2x2x1
jax: 0.10.0
libtpu: 0.0.40
codegen_flags: <defaults>
</compile_context>

<pallas_src>
import functools

import jax
import jax.numpy as jnp
from jax.experimental import pallas as pl
from jax.experimental.pallas import tpu as pltpu

MODEL_DIM = 32
NUM_LAYERS = 2
NUM_HEADS = 2                  # min(16, max(2, 2*round(32/64))) == 2
HEAD_DIM = MODEL_DIM // NUM_HEADS
DIM_FF = MODEL_DIM * 4         # 128
NUM_POSITIONS = 19
DEC_DIM = MODEL_DIM // 4       # 8
LN_EPS = 1e-5
BN_EPS = 1e-5
LANE = 128                     # lane width of the slab and of the output
VEC_ROWS = 32                  # sublane-padded row count of the vector block

# Row layout of the leading "vector" block of the slab (each row is one
# parameter vector, zero-padded to 128 lanes).
_ROW_BN_SCALE = 0
_ROW_BN_SHIFT = 1
_ROW_B_EMB = 2
_ROW_G_EMB = 3
_ROW_BE_EMB = 4
_ROW_LAYER0 = 5
_ROWS_PER_LAYER = 10           # b_q, b_k, b_v, b_o, g1, be1, b_ff1, b_ff2, g2, be2
_ROW_DEC = _ROW_LAYER0 + NUM_LAYERS * _ROWS_PER_LAYER   # 25: b1, g, be, b2


def _round8(n):
    return -(-n // 8) * 8


def slab_layout(feature_len, batch, players):
    """Static row offsets of every block inside the packed slab."""
    D, L, FF, Dd = MODEL_DIM, NUM_LAYERS, DIM_FF, DEC_DIM
    f_pad = _round8(feature_len)
    bp_pad = _round8(batch * players)
    out_rows = max(8, _round8(batch))
    lay, r = {}, 0
    lay["vec"] = r;     r += VEC_ROWS
    lay["wemb"] = r;    r += f_pad
    lay["wsq"] = r;     r += 4 * L * D         # wq*scale, wk, wv, wo per layer
    lay["wff1"] = r;    r += L * D
    lay["wff2"] = r;    r += L * FF
    lay["wdec1"] = r;   r += D
    lay["wdec2"] = r;   r += 2 * Dd
    lay["bias"] = r;    r += bp_pad            # block-diagonal attention bias
    lay["pool"] = r;    r += out_rows          # mean-pool matrix (zero rows >= B)
    lay["hmask"] = r;   r += 8                 # per-head 0/1 lane masks
    lay["decmask"] = r; r += 8                 # decoder position/coordinate masks
    lay["total"] = _round8(r)
    lay["out_rows"] = out_rows
    return lay


def _layernorm(h, g, b):
    mu = jnp.mean(h, axis=-1, keepdims=True)
    var = jnp.mean(jnp.square(h - mu), axis=-1, keepdims=True)
    return (h - mu) * jax.lax.rsqrt(var + LN_EPS) * g + b


def ghostformer_kernel(x_ref, slab_ref, out_ref, *, batch, players, feature_len):
    D, H, FF, Dd = MODEL_DIM, NUM_HEADS, DIM_FF, DEC_DIM
    F = feature_len
    BP = batch * players
    lay = slab_layout(F, batch, players)
    V = lay["vec"]

    def vrow(r, width):
        return slab_ref[V + r:V + r + 1, 0:width]            # (1, width), static

    # ---- static constants, precomputed on host, read from the slab ---------
    attn_bias = slab_ref[lay["bias"]:lay["bias"] + BP, 0:BP]          # (BP, BP)
    head_masks = [slab_ref[lay["hmask"] + i:lay["hmask"] + i + 1, 0:D]
                  for i in range(H)]                                  # H x (1, D)

    # ---- BatchNorm1d (eval, folded running stats) + feature embedding ------
    x = x_ref[...]                                           # (B*P, F)
    x = x * vrow(_ROW_BN_SCALE, F) + vrow(_ROW_BN_SHIFT, F)

    w_emb = slab_ref[lay["wemb"]:lay["wemb"] + F, 0:D]       # (F, D)
    h = jnp.dot(x, w_emb, preferred_element_type=jnp.float32) + vrow(_ROW_B_EMB, D)
    h = jnp.maximum(h, 0.0)                                  # ReLU; Dropout = id
    h = _layernorm(h, vrow(_ROW_G_EMB, D), vrow(_ROW_BE_EMB, D))

    # ---- TransformerEncoder: post-norm layers, ReLU FFN ---------------------
    for l in range(NUM_LAYERS):
        base = _ROW_LAYER0 + l * _ROWS_PER_LAYER
        r0 = lay["wsq"] + 4 * l * D
        wq = slab_ref[r0:r0 + D, 0:D]                        # pre-scaled 1/sqrt(Dh)
        wk = slab_ref[r0 + D:r0 + 2 * D, 0:D]
        wv = slab_ref[r0 + 2 * D:r0 + 3 * D, 0:D]
        wo = slab_ref[r0 + 3 * D:r0 + 4 * D, 0:D]

        q = jnp.dot(h, wq, preferred_element_type=jnp.float32) + vrow(base + 0, D)
        k = jnp.dot(h, wk, preferred_element_type=jnp.float32) + vrow(base + 1, D)
        v = jnp.dot(h, wv, preferred_element_type=jnp.float32) + vrow(base + 2, D)

        attn = None
        for m in head_masks:
            s = jax.lax.dot_general(q * m, k, (((1,), (1,)), ((), ())),
                                    preferred_element_type=jnp.float32)
            s = s + attn_bias
            s = s - jnp.max(s, axis=-1, keepdims=True)
            p = jnp.exp(s)
            # approx reciprocal (EUP slot); not bit-exact vs torch.softmax.
            p = p * pl.reciprocal(jnp.sum(p, axis=-1, keepdims=True), approx=True)
            # masked value -> per-head output lands in its own lanes; the sum
            # over heads is the concatenated multi-head output.
            pv = jnp.dot(p, v * m, preferred_element_type=jnp.float32)
            attn = pv if attn is None else attn + pv
        attn = jnp.dot(attn, wo, preferred_element_type=jnp.float32) + vrow(base + 3, D)
        h = _layernorm(h + attn, vrow(base + 4, D), vrow(base + 5, D))

        wff1 = slab_ref[lay["wff1"] + l * D:lay["wff1"] + (l + 1) * D, 0:FF]
        wff2 = slab_ref[lay["wff2"] + l * FF:lay["wff2"] + (l + 1) * FF, 0:D]
        ff = jnp.dot(h, wff1, preferred_element_type=jnp.float32) + vrow(base + 6, FF)
        ff = jnp.maximum(ff, 0.0)
        ff = jnp.dot(ff, wff2, preferred_element_type=jnp.float32) + vrow(base + 7, D)
        h = _layernorm(h + ff, vrow(base + 8, D), vrow(base + 9, D))

    # ---- AdaptiveAvgPool1d(1) over the player axis --------------------------
    # pool_mat has out_rows (>= 8) rows; rows >= batch are zero, so the output
    # tile is full (8,128) and needs no masked store.
    pool_mat = slab_ref[lay["pool"]:lay["pool"] + lay["out_rows"], 0:BP]
    pooled = jnp.dot(pool_mat, h, preferred_element_type=jnp.float32)

    # ---- fused position / coordinate decoders -------------------------------
    w1 = slab_ref[lay["wdec1"]:lay["wdec1"] + D, 0:2 * Dd]   # (D, 16)
    t = jnp.dot(pooled, w1, preferred_element_type=jnp.float32) + vrow(_ROW_DEC + 0, 2 * Dd)
    t = jnp.maximum(t, 0.0)                                  # (out_rows, 16)

    mp = slab_ref[lay["decmask"]:lay["decmask"] + 1, 0:2 * Dd]       # position block
    mc = slab_ref[lay["decmask"] + 1:lay["decmask"] + 2, 0:2 * Dd]   # coordinate block

    def block_ln(z, mask):
        mu = jnp.sum(z * mask, axis=-1, keepdims=True) * (1.0 / Dd)
        c = z - mu
        var = jnp.sum(c * c * mask, axis=-1, keepdims=True) * (1.0 / Dd)
        return c * jax.lax.rsqrt(var + LN_EPS)

    tn = mp * block_ln(t, mp) + mc * block_ln(t, mc)
    tn = tn * vrow(_ROW_DEC + 1, 2 * Dd) + vrow(_ROW_DEC + 2, 2 * Dd)

    w2 = slab_ref[lay["wdec2"]:lay["wdec2"] + 2 * Dd, :]     # (16, 128), zero-padded
    out_ref[...] = (jnp.dot(tn, w2, preferred_element_type=jnp.float32)
                    + vrow(_ROW_DEC + 3, LANE))              # (out_rows, 128) dense


def make_params(key, feature_len):
    """Deterministic synthetic parameters (shapes from GhostFormer.__init__)."""
    D, L, FF, Dd = MODEL_DIM, NUM_LAYERS, DIM_FF, DEC_DIM
    ks = iter(jax.random.split(key, 48))

    def n(shape, s=0.1):
        return jax.random.normal(next(ks), shape, jnp.float32) * s

    # BatchNorm1d(feature_len): fold gamma/beta/running stats into scale/shift.
    gamma = 1.0 + n((1, feature_len))
    beta = n((1, feature_len))
    rmean = n((1, feature_len))
    rvar = 1.0 + 0.25 * jnp.abs(jax.random.normal(next(ks), (1, feature_len),
                                                  jnp.float32))
    bn_scale = gamma * jax.lax.rsqrt(rvar + BN_EPS)
    bn_shift = beta - rmean * bn_scale

    params = [
        bn_scale, bn_shift,
        n((feature_len, D)), n((1, D)),          # embedding Linear
        1.0 + n((1, D)), n((1, D)),              # embedding LayerNorm
        n((L, D, 3 * D)), n((L, 1, 3 * D)),      # attn in-proj  (per layer)
        n((L, D, D)), n((L, 1, D)),              # attn out-proj (per layer)
        1.0 + n((L, 1, D)), n((L, 1, D)),        # norm1
        n((L, D, FF)), n((L, 1, FF)),            # FFN linear1
        n((L, FF, D)), n((L, 1, D)),              # FFN linear2
        1.0 + n((L, 1, D)), n((L, 1, D)),        # norm2
        n((D, Dd)), n((1, Dd)),                  # position decoder linear1
        1.0 + n((1, Dd)), n((1, Dd)),            # position decoder LayerNorm
        n((Dd, NUM_POSITIONS)), n((1, NUM_POSITIONS)),
        n((D, Dd)), n((1, Dd)),                  # coordinate decoder linear1
        1.0 + n((1, Dd)), n((1, Dd)),            # coordinate decoder LayerNorm
        n((Dd, 2)), n((1, 2)),
    ]
    return params


def pack_slab(params, batch, players):
    """Pack every parameter AND every static constant into one (R, 128) slab."""
    (bn_scale, bn_shift,
     w_emb, b_emb, g_emb, be_emb,
     w_qkv, b_qkv, w_o, b_o, g1, be1,
     w_ff1, b_ff1, w_ff2, b_ff2, g2, be2,
     w_p1, b_p1, g_p, be_p, w_p2, b_p2,
     w_c1, b_c1, g_c, be_c, w_c2, b_c2) = params
    D, L, FF, Dd, Dh, H = MODEL_DIM, NUM_LAYERS, DIM_FF, DEC_DIM, HEAD_DIM, NUM_HEADS
    F = w_emb.shape[0]
    P = players
    BP = batch * players
    scale = 1.0 / (Dh ** 0.5)
    lay = slab_layout(F, batch, players)
    slab = jnp.zeros((lay["total"], LANE), jnp.float32)

    def place(s, r0, a):
        a = jnp.asarray(a, jnp.float32)
        if a.ndim == 1:
            a = a.reshape(1, -1)
        return s.at[r0:r0 + a.shape[0], 0:a.shape[1]].set(a)

    # -- vector rows ----------------------------------------------------------
    V = lay["vec"]
    slab = place(slab, V + _ROW_BN_SCALE, bn_scale)
    slab = place(slab, V + _ROW_BN_SHIFT, bn_shift)
    slab = place(slab, V + _ROW_B_EMB, b_emb)
    slab = place(slab, V + _ROW_G_EMB, g_emb)
    slab = place(slab, V + _ROW_BE_EMB, be_emb)
    for l in range(L):
        base = V + _ROW_LAYER0 + l * _ROWS_PER_LAYER
        slab = place(slab, base + 0, b_qkv[l, :, 0:D] * scale)   # q bias pre-scaled
        slab = place(slab, base + 1, b_qkv[l, :, D:2 * D])
        slab = place(slab, base + 2, b_qkv[l, :, 2 * D:3 * D])
        slab = place(slab, base + 3, b_o[l])
        slab = place(slab, base + 4, g1[l])
        slab = place(slab, base + 5, be1[l])
        slab = place(slab, base + 6, b_ff1[l])
        slab = place(slab, base + 7, b_ff2[l])
        slab = place(slab, base + 8, g2[l])
        slab = place(slab, base + 9, be2[l])
    Dv = V + _ROW_DEC
    slab = place(slab, Dv + 0, jnp.concatenate([b_p1, b_c1], axis=-1))
    slab = place(slab, Dv + 1, jnp.concatenate([g_p, g_c], axis=-1))
    slab = place(slab, Dv + 2, jnp.concatenate([be_p, be_c], axis=-1))
    b2 = jnp.zeros((1, LANE), jnp.float32)
    b2 = b2.at[0, 0:NUM_POSITIONS].set(b_p2[0])
    b2 = b2.at[0, NUM_POSITIONS:NUM_POSITIONS + 2].set(b_c2[0])
    slab = place(slab, Dv + 3, b2)

    # -- matrices -------------------------------------------------------------
    slab = place(slab, lay["wemb"], w_emb)                        # (F, D)
    for l in range(L):
        r0 = lay["wsq"] + 4 * l * D
        slab = place(slab, r0 + 0 * D, w_qkv[l, :, 0:D] * scale)  # wq pre-scaled
        slab = place(slab, r0 + 1 * D, w_qkv[l, :, D:2 * D])
        slab = place(slab, r0 + 2 * D, w_qkv[l, :, 2 * D:3 * D])
        slab = place(slab, r0 + 3 * D, w_o[l])
        slab = place(slab, lay["wff1"] + l * D, w_ff1[l])         # (D, FF)
        slab = place(slab, lay["wff2"] + l * FF, w_ff2[l])        # (FF, D)
    slab = place(slab, lay["wdec1"], jnp.concatenate([w_p1, w_c1], axis=1))  # (D, 16)
    w2 = jnp.zeros((2 * Dd, LANE), jnp.float32)
    w2 = w2.at[0:Dd, 0:NUM_POSITIONS].set(w_p2)
    w2 = w2.at[Dd:2 * Dd, NUM_POSITIONS:NUM_POSITIONS + 2].set(w_c2)
    slab = place(slab, lay["wdec2"], w2)

    # -- static constants (host-precomputed: no iota/divide in the kernel) ----
    rb = jnp.arange(BP)[:, None] // P
    cb = jnp.arange(BP)[None, :] // P
    attn_bias = jnp.where(rb == cb, 0.0, -1e30).astype(jnp.float32)
    slab = place(slab, lay["bias"], attn_bias)                    # (BP, BP)

    pr = jnp.arange(lay["out_rows"])[:, None]
    pc = jnp.arange(BP)[None, :] // P
    pool = jnp.where(pc == pr, 1.0 / P, 0.0).astype(jnp.float32)  # zero rows >= B
    slab = place(slab, lay["pool"], pool)

    lanes = jnp.arange(D)[None, :]
    for h in range(H):
        m = ((lanes >= h * Dh) & (lanes < (h + 1) * Dh)).astype(jnp.float32)
        slab = place(slab, lay["hmask"] + h, m)
    lanes16 = jnp.arange(2 * Dd)[None, :]
    slab = place(slab, lay["decmask"] + 0, (lanes16 < Dd).astype(jnp.float32))
    slab = place(slab, lay["decmask"] + 1, (lanes16 >= Dd).astype(jnp.float32))
    return slab


@jax.jit
def ghostformer_forward(x, slab):
    B, P, F = x.shape
    BP = B * P
    D, FF, Dd, H, L = MODEL_DIM, DIM_FF, DEC_DIM, NUM_HEADS, NUM_LAYERS
    lay = slab_layout(F, B, P)
    x2d = x.reshape(BP, F)

    flops = 2 * BP * F * D
    flops += L * (4 * 2 * BP * D * D                 # q, k, v, out projections
                  + H * 2 * (2 * BP * BP * D)        # scores + p@v per head
                  + 2 * 2 * BP * D * FF)             # FFN
    flops += 2 * lay["out_rows"] * BP * D            # pooling matmul
    flops += 2 * lay["out_rows"] * D * (2 * Dd) + 2 * lay["out_rows"] * (2 * Dd) * LANE
    transcendentals = L * H * BP * BP
    bytes_accessed = (x2d.size + slab.size + lay["out_rows"] * LANE) * 4

    vmem = pl.BlockSpec(memory_space=pltpu.MemorySpace.VMEM)
    out = pl.pallas_call(
        functools.partial(ghostformer_kernel, batch=B, players=P, feature_len=F),
        out_shape=jax.ShapeDtypeStruct((lay["out_rows"], LANE), jnp.float32),
        in_specs=[vmem, vmem],
        out_specs=vmem,
        cost_estimate=pl.CostEstimate(flops=flops,
                                      transcendentals=transcendentals,
                                      bytes_accessed=bytes_accessed),
    )(x2d, slab)
    position_logits = out[:B, :NUM_POSITIONS]
    coordinates = out[:B, NUM_POSITIONS:NUM_POSITIONS + 2]
    return position_logits, coordinates


if __name__ == "__main__":
    B, P, F = 2, 8, 16   # batch, players (seq), feature_len
    key = jax.random.PRNGKey(0)
    kx, kp = jax.random.split(key)
    x = jax.random.normal(kx, (B, P, F), jnp.float32)
    params = make_params(kp, F)
    slab = pack_slab(params, B, P)   # one constant (712, 128) operand

    position_logits, coordinates = ghostformer_forward(x, slab)
    jax.block_until_ready((position_logits, coordinates))
    assert position_logits.shape == (B, NUM_POSITIONS)
    assert coordinates.shape == (B, 2)
    assert bool(jnp.all(jnp.isfinite(position_logits)))
    assert bool(jnp.all(jnp.isfinite(coordinates)))
    print("KERNEL_OK")
</pallas_src>

<mosaic_0001>
module attributes {stable_mosaic.version = 11 : i64} {
  func.func @ghostformer_kernel(%arg0: memref<16x16xf32, #tpu.memory_space<vmem>>, %arg1: memref<712x128xf32, #tpu.memory_space<vmem>>, %arg2: memref<8x128xf32, #tpu.memory_space<vmem>>) attributes {dimension_semantics = [], scalar_prefetch = 0 : i64, scratch_operands = 0 : i64, tpu.core_type = #tpu.core_type<tc>} {
    %c672 = arith.constant 672 : index
    %c0 = arith.constant 0 : index
    %0 = vector.load %arg1[%c672, %c0] : memref<712x128xf32, #tpu.memory_space<vmem>>, vector<16x16xf32>
    %c696 = arith.constant 696 : index
    %c0_0 = arith.constant 0 : index
    %1 = vector.load %arg1[%c696, %c0_0] : memref<712x128xf32, #tpu.memory_space<vmem>>, vector<1x32xf32>
    %c697 = arith.constant 697 : index
    %c0_1 = arith.constant 0 : index
    %2 = vector.load %arg1[%c697, %c0_1] : memref<712x128xf32, #tpu.memory_space<vmem>>, vector<1x32xf32>
    %c0_2 = arith.constant 0 : index
    %c0_3 = arith.constant 0 : index
    %3 = vector.load %arg0[%c0_2, %c0_3] : memref<16x16xf32, #tpu.memory_space<vmem>>, vector<16x16xf32>
    %c0_4 = arith.constant 0 : index
    %c0_5 = arith.constant 0 : index
    %4 = vector.load %arg1[%c0_4, %c0_5] : memref<712x128xf32, #tpu.memory_space<vmem>>, vector<1x16xf32>
    %5 = vector.broadcast %4 : vector<1x16xf32> to vector<16x16xf32>
    %6 = arith.mulf %3, %5 : vector<16x16xf32>
    %c1 = arith.constant 1 : index
    %c0_6 = arith.constant 0 : index
    %7 = vector.load %arg1[%c1, %c0_6] : memref<712x128xf32, #tpu.memory_space<vmem>>, vector<1x16xf32>
    %8 = vector.broadcast %7 : vector<1x16xf32> to vector<16x16xf32>
    %9 = arith.addf %6, %8 : vector<16x16xf32>
    %c32 = arith.constant 32 : index
    %c0_7 = arith.constant 0 : index
    %10 = vector.load %arg1[%c32, %c0_7] : memref<712x128xf32, #tpu.memory_space<vmem>>, vector<16x32xf32>
    %cst = arith.constant dense<0.000000e+00> : vector<16x32xf32>
    %11 = tpu.matmul %9, %10, %cst {dimension_numbers = #tpu.dot_dimension_numbers<[1], [0], [0], [1], [0, 0, 1, 1], [], []>} : vector<16x16xf32>, vector<16x32xf32>, vector<16x32xf32> -> vector<16x32xf32>
    %c2 = arith.constant 2 : index
    %c0_8 = arith.constant 0 : index
    %12 = vector.load %arg1[%c2, %c0_8] : memref<712x128xf32, #tpu.memory_space<vmem>>, vector<1x32xf32>
    %13 = vector.broadcast %12 : vector<1x32xf32> to vector<16x32xf32>
    %14 = arith.addf %11, %13 : vector<16x32xf32>
    %cst_9 = arith.constant 0.000000e+00 : f32
    %15 = vector.broadcast %cst_9 : f32 to vector<16x32xf32>
    %16 = arith.maximumf %14, %15 : vector<16x32xf32>
    %c3 = arith.constant 3 : index
    %c0_10 = arith.constant 0 : index
    %17 = vector.load %arg1[%c3, %c0_10] : memref<712x128xf32, #tpu.memory_space<vmem>>, vector<1x32xf32>
    %c4 = arith.constant 4 : index
    %c0_11 = arith.constant 0 : index
    %18 = vector.load %arg1[%c4, %c0_11] : memref<712x128xf32, #tpu.memory_space<vmem>>, vector<1x32xf32>
    %cst_12 = arith.constant dense<0.000000e+00> : vector<16xf32>
    %19 = vector.multi_reduction <add>, %16, %cst_12 [1] : vector<16x32xf32> to vector<16xf32>
    %20 = vector.shape_cast %19 : vector<16xf32> to vector<16x1xf32>
    %cst_13 = arith.constant 3.200000e+01 : f32
    %21 = vector.broadcast %cst_13 : f32 to vector<16x1xf32>
    %22 = arith.divf %20, %21 : vector<16x1xf32>
    %23 = vector.broadcast %22 : vector<16x1xf32> to vector<16x32xf32>
    %24 = arith.subf %16, %23 : vector<16x32xf32>
    %25 = arith.mulf %24, %24 : vector<16x32xf32>
    %cst_14 = arith.constant dense<0.000000e+00> : vector<16xf32>
    %26 = vector.multi_reduction <add>, %25, %cst_14 [1] : vector<16x32xf32> to vector<16xf32>
    %27 = vector.shape_cast %26 : vector<16xf32> to vector<16x1xf32>
    %cst_15 = arith.constant 3.200000e+01 : f32
    %28 = vector.broadcast %cst_15 : f32 to vector<16x1xf32>
    %29 = arith.divf %27, %28 : vector<16x1xf32>
    %30 = vector.broadcast %22 : vector<16x1xf32> to vector<16x32xf32>
    %31 = arith.subf %16, %30 : vector<16x32xf32>
    %cst_16 = arith.constant 9.99999974E-6 : f32
    %32 = vector.broadcast %cst_16 : f32 to vector<16x1xf32>
    %33 = arith.addf %29, %32 : vector<16x1xf32>
    %34 = math.rsqrt %33 : vector<16x1xf32>
    %35 = vector.broadcast %34 : vector<16x1xf32> to vector<16x32xf32>
    %36 = arith.mulf %31, %35 : vector<16x32xf32>
    %37 = vector.broadcast %17 : vector<1x32xf32> to vector<16x32xf32>
    %38 = arith.mulf %36, %37 : vector<16x32xf32>
    %39 = vector.broadcast %18 : vector<1x32xf32> to vector<16x32xf32>
    %40 = arith.addf %38, %39 : vector<16x32xf32>
    %c48 = arith.constant 48 : index
    %c0_17 = arith.constant 0 : index
    %41 = vector.load %arg1[%c48, %c0_17] : memref<712x128xf32, #tpu.memory_space<vmem>>, vector<32x32xf32>
    %c80 = arith.constant 80 : index
    %c0_18 = arith.constant 0 : index
    %42 = vector.load %arg1[%c80, %c0_18] : memref<712x128xf32, #tpu.memory_space<vmem>>, vector<32x32xf32>
    %c112 = arith.constant 112 : index
    %c0_19 = arith.constant 0 : index
    %43 = vector.load %arg1[%c112, %c0_19] : memref<712x128xf32, #tpu.memory_space<vmem>>, vector<32x32xf32>
    %c144 = arith.constant 144 : index
    %c0_20 = arith.constant 0 : index
    %44 = vector.load %arg1[%c144, %c0_20] : memref<712x128xf32, #tpu.memory_space<vmem>>, vector<32x32xf32>
    %cst_21 = arith.constant dense<0.000000e+00> : vector<16x32xf32>
    %45 = tpu.matmul %40, %41, %cst_21 {dimension_numbers = #tpu.dot_dimension_numbers<[1], [0], [0], [1], [0, 0, 1, 1], [], []>} : vector<16x32xf32>, vector<32x32xf32>, vector<16x32xf32> -> vector<16x32xf32>
    %c5 = arith.constant 5 : index
    %c0_22 = arith.constant 0 : index
    %46 = vector.load %arg1[%c5, %c0_22] : memref<712x128xf32, #tpu.memory_space<vmem>>, vector<1x32xf32>
    %47 = vector.broadcast %46 : vector<1x32xf32> to vector<16x32xf32>
    %48 = arith.addf %45, %47 : vector<16x32xf32>
    %cst_23 = arith.constant dense<0.000000e+00> : vector<16x32xf32>
    %49 = tpu.matmul %40, %42, %cst_23 {dimension_numbers = #tpu.dot_dimension_numbers<[1], [0], [0], [1], [0, 0, 1, 1], [], []>} : vector<16x32xf32>, vector<32x32xf32>, vector<16x32xf32> -> vector<16x32xf32>
    %c6 = arith.constant 6 : index
    %c0_24 = arith.constant 0 : index
    %50 = vector.load %arg1[%c6, %c0_24] : memref<712x128xf32, #tpu.memory_space<vmem>>, vector<1x32xf32>
    %51 = vector.broadcast %50 : vector<1x32xf32> to vector<16x32xf32>
    %52 = arith.addf %49, %51 : vector<16x32xf32>
    %cst_25 = arith.constant dense<0.000000e+00> : vector<16x32xf32>
    %53 = tpu.matmul %40, %43, %cst_25 {dimension_numbers = #tpu.dot_dimension_numbers<[1], [0], [0], [1], [0, 0, 1, 1], [], []>} : vector<16x32xf32>, vector<32x32xf32>, vector<16x32xf32> -> vector<16x32xf32>
    %c7 = arith.constant 7 : index
    %c0_26 = arith.constant 0 : index
    %54 = vector.load %arg1[%c7, %c0_26] : memref<712x128xf32, #tpu.memory_space<vmem>>, vector<1x32xf32>
    %55 = vector.broadcast %54 : vector<1x32xf32> to vector<16x32xf32>
    %56 = arith.addf %53, %55 : vector<16x32xf32>
    %57 = vector.broadcast %1 : vector<1x32xf32> to vector<16x32xf32>
    %58 = arith.mulf %48, %57 : vector<16x32xf32>
    %cst_27 = arith.constant dense<0.000000e+00> : vector<16x16xf32>
    %59 = tpu.matmul %58, %52, %cst_27 {dimension_numbers = #tpu.dot_dimension_numbers<[1], [1], [0], [0], [0, 0, 1, 0], [], []>} : vector<16x32xf32>, vector<16x32xf32>, vector<16x16xf32> -> vector<16x16xf32>
    %60 = arith.addf %59, %0 : vector<16x16xf32>
    %cst_28 = arith.constant dense<0xFF800000> : vector<16xf32>
    %61 = vector.multi_reduction <maximumf>, %60, %cst_28 [1] : vector<16x16xf32> to vector<16xf32>
    %62 = vector.shape_cast %61 : vector<16xf32> to vector<16x1xf32>
    %63 = vector.broadcast %62 : vector<16x1xf32> to vector<16x16xf32>
    %64 = arith.subf %60, %63 : vector<16x16xf32>
    %65 = math.exp %64 : vector<16x16xf32>
    %cst_29 = arith.constant dense<0.000000e+00> : vector<16xf32>
    %66 = vector.multi_reduction <add>, %65, %cst_29 [1] : vector<16x16xf32> to vector<16xf32>
    %67 = vector.shape_cast %66 : vector<16xf32> to vector<16x1xf32>
    %68 = tpu.reciprocal %67 {approx = true} : vector<16x1xf32> -> vector<16x1xf32>
    %69 = vector.broadcast %68 : vector<16x1xf32> to vector<16x16xf32>
    %70 = arith.mulf %65, %69 : vector<16x16xf32>
    %71 = vector.broadcast %1 : vector<1x32xf32> to vector<16x32xf32>
    %72 = arith.mulf %56, %71 : vector<16x32xf32>
    %cst_30 = arith.constant dense<0.000000e+00> : vector<16x32xf32>
    %73 = tpu.matmul %70, %72, %cst_30 {dimension_numbers = #tpu.dot_dimension_numbers<[1], [0], [0], [1], [0, 0, 1, 1], [], []>} : vector<16x16xf32>, vector<16x32xf32>, vector<16x32xf32> -> vector<16x32xf32>
    %74 = vector.broadcast %2 : vector<1x32xf32> to vector<16x32xf32>
    %75 = arith.mulf %48, %74 : vector<16x32xf32>
    %cst_31 = arith.constant dense<0.000000e+00> : vector<16x16xf32>
    %76 = tpu.matmul %75, %52, %cst_31 {dimension_numbers = #tpu.dot_dimension_numbers<[1], [1], [0], [0], [0, 0, 1, 0], [], []>} : vector<16x32xf32>, vector<16x32xf32>, vector<16x16xf32> -> vector<16x16xf32>
    %77 = arith.addf %76, %0 : vector<16x16xf32>
    %cst_32 = arith.constant dense<0xFF800000> : vector<16xf32>
    %78 = vector.multi_reduction <maximumf>, %77, %cst_32 [1] : vector<16x16xf32> to vector<16xf32>
    %79 = vector.shape_cast %78 : vector<16xf32> to vector<16x1xf32>
    %80 = vector.broadcast %79 : vector<16x1xf32> to vector<16x16xf32>
    %81 = arith.subf %77, %80 : vector<16x16xf32>
    %82 = math.exp %81 : vector<16x16xf32>
    %cst_33 = arith.constant dense<0.000000e+00> : vector<16xf32>
    %83 = vector.multi_reduction <add>, %82, %cst_33 [1] : vector<16x16xf32> to vector<16xf32>
    %84 = vector.shape_cast %83 : vector<16xf32> to vector<16x1xf32>
    %85 = tpu.reciprocal %84 {approx = true} : vector<16x1xf32> -> vector<16x1xf32>
    %86 = vector.broadcast %85 : vector<16x1xf32> to vector<16x16xf32>
    %87 = arith.mulf %82, %86 : vector<16x16xf32>
    %88 = vector.broadcast %2 : vector<1x32xf32> to vector<16x32xf32>
    %89 = arith.mulf %56, %88 : vector<16x32xf32>
    %cst_34 = arith.constant dense<0.000000e+00> : vector<16x32xf32>
    %90 = tpu.matmul %87, %89, %cst_34 {dimension_numbers = #tpu.dot_dimension_numbers<[1], [0], [0], [1], [0, 0, 1, 1], [], []>} : vector<16x16xf32>, vector<16x32xf32>, vector<16x32xf32> -> vector<16x32xf32>
    %91 = arith.addf %73, %90 : vector<16x32xf32>
    %cst_35 = arith.constant dense<0.000000e+00> : vector<16x32xf32>
    %92 = tpu.matmul %91, %44, %cst_35 {dimension_numbers = #tpu.dot_dimension_numbers<[1], [0], [0], [1], [0, 0, 1, 1], [], []>} : vector<16x32xf32>, vector<32x32xf32>, vector<16x32xf32> -> vector<16x32xf32>
    %c8 = arith.constant 8 : index
    %c0_36 = arith.constant 0 : index
    %93 = vector.load %arg1[%c8, %c0_36] : memref<712x128xf32, #tpu.memory_space<vmem>>, vector<1x32xf32>
    %94 = vector.broadcast %93 : vector<1x32xf32> to vector<16x32xf32>
    %95 = arith.addf %92, %94 : vector<16x32xf32>
    %96 = arith.addf %40, %95 : vector<16x32xf32>
    %c9 = arith.constant 9 : index
    %c0_37 = arith.constant 0 : index
    %97 = vector.load %arg1[%c9, %c0_37] : memref<712x128xf32, #tpu.memory_space<vmem>>, vector<1x32xf32>
    %c10 = arith.constant 10 : index
    %c0_38 = arith.constant 0 : index
    %98 = vector.load %arg1[%c10, %c0_38] : memref<712x128xf32, #tpu.memory_space<vmem>>, vector<1x32xf32>
    %cst_39 = arith.constant dense<0.000000e+00> : vector<16xf32>
    %99 = vector.multi_reduction <add>, %96, %cst_39 [1] : vector<16x32xf32> to vector<16xf32>
    %100 = vector.shape_cast %99 : vector<16xf32> to vector<16x1xf32>
    %cst_40 = arith.constant 3.200000e+01 : f32
    %101 = vector.broadcast %cst_40 : f32 to vector<16x1xf32>
    %102 = arith.divf %100, %101 : vector<16x1xf32>
    %103 = vector.broadcast %102 : vector<16x1xf32> to vector<16x32xf32>
    %104 = arith.subf %96, %103 : vector<16x32xf32>
    %105 = arith.mulf %104, %104 : vector<16x32xf32>
    %cst_41 = arith.constant dense<0.000000e+00> : vector<16xf32>
    %106 = vector.multi_reduction <add>, %105, %cst_41 [1] : vector<16x32xf32> to vector<16xf32>
    %107 = vector.shape_cast %106 : vector<16xf32> to vector<16x1xf32>
    %cst_42 = arith.constant 3.200000e+01 : f32
    %108 = vector.broadcast %cst_42 : f32 to vector<16x1xf32>
    %109 = arith.divf %107, %108 : vector<16x1xf32>
    %110 = vector.broadcast %102 : vector<16x1xf32> to vector<16x32xf32>
    %111 = arith.subf %96, %110 : vector<16x32xf32>
    %cst_43 = arith.constant 9.99999974E-6 : f32
    %112 = vector.broadcast %cst_43 : f32 to vector<16x1xf32>
    %113 = arith.addf %109, %112 : vector<16x1xf32>
    %114 = math.rsqrt %113 : vector<16x1xf32>
    %115 = vector.broadcast %114 : vector<16x1xf32> to vector<16x32xf32>
    %116 = arith.mulf %111, %115 : vector<16x32xf32>
    %117 = vector.broadcast %97 : vector<1x32xf32> to vector<16x32xf32>
    %118 = arith.mulf %116, %117 : vector<16x32xf32>
    %119 = vector.broadcast %98 : vector<1x32xf32> to vector<16x32xf32>
    %120 = arith.addf %118, %119 : vector<16x32xf32>
    %c304 = arith.constant 304 : index
    %c0_44 = arith.constant 0 : index
    %121 = vector.load %arg1[%c304, %c0_44] : memref<712x128xf32, #tpu.memory_space<vmem>>, vector<32x128xf32>
    %c368 = arith.constant 368 : index
    %c0_45 = arith.constant 0 : index
    %122 = vector.load %arg1[%c368, %c0_45] : memref<712x128xf32, #tpu.memory_space<vmem>>, vector<128x32xf32>
    %cst_46 = arith.constant dense<0.000000e+00> : vector<16x128xf32>
    %123 = tpu.matmul %120, %121, %cst_46 {dimension_numbers = #tpu.dot_dimension_numbers<[1], [0], [0], [1], [0, 0, 1, 1], [], []>} : vector<16x32xf32>, vector<32x128xf32>, vector<16x128xf32> -> vector<16x128xf32>
    %c11 = arith.constant 11 : index
    %c0_47 = arith.constant 0 : index
    %124 = vector.load %arg1[%c11, %c0_47] : memref<712x128xf32, #tpu.memory_space<vmem>>, vector<1x128xf32>
    %125 = vector.broadcast %124 : vector<1x128xf32> to vector<16x128xf32>
    %126 = arith.addf %123, %125 : vector<16x128xf32>
    %cst_48 = arith.constant 0.000000e+00 : f32
    %127 = vector.broadcast %cst_48 : f32 to vector<16x128xf32>
    %128 = arith.maximumf %126, %127 : vector<16x128xf32>
    %cst_49 = arith.constant dense<0.000000e+00> : vector<16x32xf32>
    %129 = tpu.matmul %128, %122, %cst_49 {dimension_numbers = #tpu.dot_dimension_numbers<[1], [0], [0], [1], [0, 0, 1, 1], [], []>} : vector<16x128xf32>, vector<128x32xf32>, vector<16x32xf32> -> vector<16x32xf32>
    %c12 = arith.constant 12 : index
    %c0_50 = arith.constant 0 : index
    %130 = vector.load %arg1[%c12, %c0_50] : memref<712x128xf32, #tpu.memory_space<vmem>>, vector<1x32xf32>
    %131 = vector.broadcast %130 : vector<1x32xf32> to vector<16x32xf32>
    %132 = arith.addf %129, %131 : vector<16x32xf32>
    %133 = arith.addf %120, %132 : vector<16x32xf32>
    %c13 = arith.constant 13 : index
    %c0_51 = arith.constant 0 : index
    %134 = vector.load %arg1[%c13, %c0_51] : memref<712x128xf32, #tpu.memory_space<vmem>>, vector<1x32xf32>
    %c14 = arith.constant 14 : index
    %c0_52 = arith.constant 0 : index
    %135 = vector.load %arg1[%c14, %c0_52] : memref<712x128xf32, #tpu.memory_space<vmem>>, vector<1x32xf32>
    %cst_53 = arith.constant dense<0.000000e+00> : vector<16xf32>
    %136 = vector.multi_reduction <add>, %133, %cst_53 [1] : vector<16x32xf32> to vector<16xf32>
    %137 = vector.shape_cast %136 : vector<16xf32> to vector<16x1xf32>
    %cst_54 = arith.constant 3.200000e+01 : f32
    %138 = vector.broadcast %cst_54 : f32 to vector<16x1xf32>
    %139 = arith.divf %137, %138 : vector<16x1xf32>
    %140 = vector.broadcast %139 : vector<16x1xf32> to vector<16x32xf32>
    %141 = arith.subf %133, %140 : vector<16x32xf32>
    %142 = arith.mulf %141, %141 : vector<16x32xf32>
    %cst_55 = arith.constant dense<0.000000e+00> : vector<16xf32>
    %143 = vector.multi_reduction <add>, %142, %cst_55 [1] : vector<16x32xf32> to vector<16xf32>
    %144 = vector.shape_cast %143 : vector<16xf32> to vector<16x1xf32>
    %cst_56 = arith.constant 3.200000e+01 : f32
    %145 = vector.broadcast %cst_56 : f32 to vector<16x1xf32>
    %146 = arith.divf %144, %145 : vector<16x1xf32>
    %147 = vector.broadcast %139 : vector<16x1xf32> to vector<16x32xf32>
    %148 = arith.subf %133, %147 : vector<16x32xf32>
    %cst_57 = arith.constant 9.99999974E-6 : f32
    %149 = vector.broadcast %cst_57 : f32 to vector<16x1xf32>
    %150 = arith.addf %146, %149 : vector<16x1xf32>
    %151 = math.rsqrt %150 : vector<16x1xf32>
    %152 = vector.broadcast %151 : vector<16x1xf32> to vector<16x32xf32>
    %153 = arith.mulf %148, %152 : vector<16x32xf32>
    %154 = vector.broadcast %134 : vector<1x32xf32> to vector<16x32xf32>
    %155 = arith.mulf %153, %154 : vector<16x32xf32>
    %156 = vector.broadcast %135 : vector<1x32xf32> to vector<16x32xf32>
    %157 = arith.addf %155, %156 : vector<16x32xf32>
    %c176 = arith.constant 176 : index
    %c0_58 = arith.constant 0 : index
    %158 = vector.load %arg1[%c176, %c0_58] : memref<712x128xf32, #tpu.memory_space<vmem>>, vector<32x32xf32>
    %c208 = arith.constant 208 : index
    %c0_59 = arith.constant 0 : index
    %159 = vector.load %arg1[%c208, %c0_59] : memref<712x128xf32, #tpu.memory_space<vmem>>, vector<32x32xf32>
    %c240 = arith.constant 240 : index
    %c0_60 = arith.constant 0 : index
    %160 = vector.load %arg1[%c240, %c0_60] : memref<712x128xf32, #tpu.memory_space<vmem>>, vector<32x32xf32>
    %c272 = arith.constant 272 : index
    %c0_61 = arith.constant 0 : index
    %161 = vector.load %arg1[%c272, %c0_61] : memref<712x128xf32, #tpu.memory_space<vmem>>, vector<32x32xf32>
    %cst_62 = arith.constant dense<0.000000e+00> : vector<16x32xf32>
    %162 = tpu.matmul %157, %158, %cst_62 {dimension_numbers = #tpu.dot_dimension_numbers<[1], [0], [0], [1], [0, 0, 1, 1], [], []>} : vector<16x32xf32>, vector<32x32xf32>, vector<16x32xf32> -> vector<16x32xf32>
    %c15 = arith.constant 15 : index
    %c0_63 = arith.constant 0 : index
    %163 = vector.load %arg1[%c15, %c0_63] : memref<712x128xf32, #tpu.memory_space<vmem>>, vector<1x32xf32>
    %164 = vector.broadcast %163 : vector<1x32xf32> to vector<16x32xf32>
    %165 = arith.addf %162, %164 : vector<16x32xf32>
    %cst_64 = arith.constant dense<0.000000e+00> : vector<16x32xf32>
    %166 = tpu.matmul %157, %159, %cst_64 {dimension_numbers = #tpu.dot_dimension_numbers<[1], [0], [0], [1], [0, 0, 1, 1], [], []>} : vector<16x32xf32>, vector<32x32xf32>, vector<16x32xf32> -> vector<16x32xf32>
    %c16 = arith.constant 16 : index
    %c0_65 = arith.constant 0 : index
    %167 = vector.load %arg1[%c16, %c0_65] : memref<712x128xf32, #tpu.memory_space<vmem>>, vector<1x32xf32>
    %168 = vector.broadcast %167 : vector<1x32xf32> to vector<16x32xf32>
    %169 = arith.addf %166, %168 : vector<16x32xf32>
    %cst_66 = arith.constant dense<0.000000e+00> : vector<16x32xf32>
    %170 = tpu.matmul %157, %160, %cst_66 {dimension_numbers = #tpu.dot_dimension_numbers<[1], [0], [0], [1], [0, 0, 1, 1], [], []>} : vector<16x32xf32>, vector<32x32xf32>, vector<16x32xf32> -> vector<16x32xf32>
    %c17 = arith.constant 17 : index
    %c0_67 = arith.constant 0 : index
    %171 = vector.load %arg1[%c17, %c0_67] : memref<712x128xf32, #tpu.memory_space<vmem>>, vector<1x32xf32>
    %172 = vector.broadcast %171 : vector<1x32xf32> to vector<16x32xf32>
    %173 = arith.addf %170, %172 : vector<16x32xf32>
    %174 = vector.broadcast %1 : vector<1x32xf32> to vector<16x32xf32>
    %175 = arith.mulf %165, %174 : vector<16x32xf32>
    %cst_68 = arith.constant dense<0.000000e+00> : vector<16x16xf32>
    %176 = tpu.matmul %175, %169, %cst_68 {dimension_numbers = #tpu.dot_dimension_numbers<[1], [1], [0], [0], [0, 0, 1, 0], [], []>} : vector<16x32xf32>, vector<16x32xf32>, vector<16x16xf32> -> vector<16x16xf32>
    %177 = arith.addf %176, %0 : vector<16x16xf32>
    %cst_69 = arith.constant dense<0xFF800000> : vector<16xf32>
    %178 = vector.multi_reduction <maximumf>, %177, %cst_69 [1] : vector<16x16xf32> to vector<16xf32>
    %179 = vector.shape_cast %178 : vector<16xf32> to vector<16x1xf32>
    %180 = vector.broadcast %179 : vector<16x1xf32> to vector<16x16xf32>
    %181 = arith.subf %177, %180 : vector<16x16xf32>
    %182 = math.exp %181 : vector<16x16xf32>
    %cst_70 = arith.constant dense<0.000000e+00> : vector<16xf32>
    %183 = vector.multi_reduction <add>, %182, %cst_70 [1] : vector<16x16xf32> to vector<16xf32>
    %184 = vector.shape_cast %183 : vector<16xf32> to vector<16x1xf32>
    %185 = tpu.reciprocal %184 {approx = true} : vector<16x1xf32> -> vector<16x1xf32>
    %186 = vector.broadcast %185 : vector<16x1xf32> to vector<16x16xf32>
    %187 = arith.mulf %182, %186 : vector<16x16xf32>
    %188 = vector.broadcast %1 : vector<1x32xf32> to vector<16x32xf32>
    %189 = arith.mulf %173, %188 : vector<16x32xf32>
    %cst_71 = arith.constant dense<0.000000e+00> : vector<16x32xf32>
    %190 = tpu.matmul %187, %189, %cst_71 {dimension_numbers = #tpu.dot_dimension_numbers<[1], [0], [0], [1], [0, 0, 1, 1], [], []>} : vector<16x16xf32>, vector<16x32xf32>, vector<16x32xf32> -> vector<16x32xf32>
    %191 = vector.broadcast %2 : vector<1x32xf32> to vector<16x32xf32>
    %192 = arith.mulf %165, %191 : vector<16x32xf32>
    %cst_72 = arith.constant dense<0.000000e+00> : vector<16x16xf32>
    %193 = tpu.matmul %192, %169, %cst_72 {dimension_numbers = #tpu.dot_dimension_numbers<[1], [1], [0], [0], [0, 0, 1, 0], [], []>} : vector<16x32xf32>, vector<16x32xf32>, vector<16x16xf32> -> vector<16x16xf32>
    %194 = arith.addf %193, %0 : vector<16x16xf32>
    %cst_73 = arith.constant dense<0xFF800000> : vector<16xf32>
    %195 = vector.multi_reduction <maximumf>, %194, %cst_73 [1] : vector<16x16xf32> to vector<16xf32>
    %196 = vector.shape_cast %195 : vector<16xf32> to vector<16x1xf32>
    %197 = vector.broadcast %196 : vector<16x1xf32> to vector<16x16xf32>
    %198 = arith.subf %194, %197 : vector<16x16xf32>
    %199 = math.exp %198 : vector<16x16xf32>
    %cst_74 = arith.constant dense<0.000000e+00> : vector<16xf32>
    %200 = vector.multi_reduction <add>, %199, %cst_74 [1] : vector<16x16xf32> to vector<16xf32>
    %201 = vector.shape_cast %200 : vector<16xf32> to vector<16x1xf32>
    %202 = tpu.reciprocal %201 {approx = true} : vector<16x1xf32> -> vector<16x1xf32>
    %203 = vector.broadcast %202 : vector<16x1xf32> to vector<16x16xf32>
    %204 = arith.mulf %199, %203 : vector<16x16xf32>
    %205 = vector.broadcast %2 : vector<1x32xf32> to vector<16x32xf32>
    %206 = arith.mulf %173, %205 : vector<16x32xf32>
    %cst_75 = arith.constant dense<0.000000e+00> : vector<16x32xf32>
    %207 = tpu.matmul %204, %206, %cst_75 {dimension_numbers = #tpu.dot_dimension_numbers<[1], [0], [0], [1], [0, 0, 1, 1], [], []>} : vector<16x16xf32>, vector<16x32xf32>, vector<16x32xf32> -> vector<16x32xf32>
    %208 = arith.addf %190, %207 : vector<16x32xf32>
    %cst_76 = arith.constant dense<0.000000e+00> : vector<16x32xf32>
    %209 = tpu.matmul %208, %161, %cst_76 {dimension_numbers = #tpu.dot_dimension_numbers<[1], [0], [0], [1], [0, 0, 1, 1], [], []>} : vector<16x32xf32>, vector<32x32xf32>, vector<16x32xf32> -> vector<16x32xf32>
    %c18 = arith.constant 18 : index
    %c0_77 = arith.constant 0 : index
    %210 = vector.load %arg1[%c18, %c0_77] : memref<712x128xf32, #tpu.memory_space<vmem>>, vector<1x32xf32>
    %211 = vector.broadcast %210 : vector<1x32xf32> to vector<16x32xf32>
    %212 = arith.addf %209, %211 : vector<16x32xf32>
    %213 = arith.addf %157, %212 : vector<16x32xf32>
    %c19 = arith.constant 19 : index
    %c0_78 = arith.constant 0 : index
    %214 = vector.load %arg1[%c19, %c0_78] : memref<712x128xf32, #tpu.memory_space<vmem>>, vector<1x32xf32>
    %c20 = arith.constant 20 : index
    %c0_79 = arith.constant 0 : index
    %215 = vector.load %arg1[%c20, %c0_79] : memref<712x128xf32, #tpu.memory_space<vmem>>, vector<1x32xf32>
    %cst_80 = arith.constant dense<0.000000e+00> : vector<16xf32>
    %216 = vector.multi_reduction <add>, %213, %cst_80 [1] : vector<16x32xf32> to vector<16xf32>
    %217 = vector.shape_cast %216 : vector<16xf32> to vector<16x1xf32>
    %cst_81 = arith.constant 3.200000e+01 : f32
    %218 = vector.broadcast %cst_81 : f32 to vector<16x1xf32>
    %219 = arith.divf %217, %218 : vector<16x1xf32>
    %220 = vector.broadcast %219 : vector<16x1xf32> to vector<16x32xf32>
    %221 = arith.subf %213, %220 : vector<16x32xf32>
    %222 = arith.mulf %221, %221 : vector<16x32xf32>
    %cst_82 = arith.constant dense<0.000000e+00> : vector<16xf32>
    %223 = vector.multi_reduction <add>, %222, %cst_82 [1] : vector<16x32xf32> to vector<16xf32>
    %224 = vector.shape_cast %223 : vector<16xf32> to vector<16x1xf32>
    %cst_83 = arith.constant 3.200000e+01 : f32
    %225 = vector.broadcast %cst_83 : f32 to vector<16x1xf32>
    %226 = arith.divf %224, %225 : vector<16x1xf32>
    %227 = vector.broadcast %219 : vector<16x1xf32> to vector<16x32xf32>
    %228 = arith.subf %213, %227 : vector<16x32xf32>
    %cst_84 = arith.constant 9.99999974E-6 : f32
    %229 = vector.broadcast %cst_84 : f32 to vector<16x1xf32>
    %230 = arith.addf %226, %229 : vector<16x1xf32>
    %231 = math.rsqrt %230 : vector<16x1xf32>
    %232 = vector.broadcast %231 : vector<16x1xf32> to vector<16x32xf32>
    %233 = arith.mulf %228, %232 : vector<16x32xf32>
    %234 = vector.broadcast %214 : vector<1x32xf32> to vector<16x32xf32>
    %235 = arith.mulf %233, %234 : vector<16x32xf32>
    %236 = vector.broadcast %215 : vector<1x32xf32> to vector<16x32xf32>
    %237 = arith.addf %235, %236 : vector<16x32xf32>
    %c336 = arith.constant 336 : index
    %c0_85 = arith.constant 0 : index
    %238 = vector.load %arg1[%c336, %c0_85] : memref<712x128xf32, #tpu.memory_space<vmem>>, vector<32x128xf32>
    %c496 = arith.constant 496 : index
    %c0_86 = arith.constant 0 : index
    %239 = vector.load %arg1[%c496, %c0_86] : memref<712x128xf32, #tpu.memory_space<vmem>>, vector<128x32xf32>
    %cst_87 = arith.constant dense<0.000000e+00> : vector<16x128xf32>
    %240 = tpu.matmul %237, %238, %cst_87 {dimension_numbers = #tpu.dot_dimension_numbers<[1], [0], [0], [1], [0, 0, 1, 1], [], []>} : vector<16x32xf32>, vector<32x128xf32>, vector<16x128xf32> -> vector<16x128xf32>
    %c21 = arith.constant 21 : index
    %c0_88 = arith.constant 0 : index
    %241 = vector.load %arg1[%c21, %c0_88] : memref<712x128xf32, #tpu.memory_space<vmem>>, vector<1x128xf32>
    %242 = vector.broadcast %241 : vector<1x128xf32> to vector<16x128xf32>
    %243 = arith.addf %240, %242 : vector<16x128xf32>
    %cst_89 = arith.constant 0.000000e+00 : f32
    %244 = vector.broadcast %cst_89 : f32 to vector<16x128xf32>
    %245 = arith.maximumf %243, %244 : vector<16x128xf32>
    %cst_90 = arith.constant dense<0.000000e+00> : vector<16x32xf32>
    %246 = tpu.matmul %245, %239, %cst_90 {dimension_numbers = #tpu.dot_dimension_numbers<[1], [0], [0], [1], [0, 0, 1, 1], [], []>} : vector<16x128xf32>, vector<128x32xf32>, vector<16x32xf32> -> vector<16x32xf32>
    %c22 = arith.constant 22 : index
    %c0_91 = arith.constant 0 : index
    %247 = vector.load %arg1[%c22, %c0_91] : memref<712x128xf32, #tpu.memory_space<vmem>>, vector<1x32xf32>
    %248 = vector.broadcast %247 : vector<1x32xf32> to vector<16x32xf32>
    %249 = arith.addf %246, %248 : vector<16x32xf32>
    %250 = arith.addf %237, %249 : vector<16x32xf32>
    %c23 = arith.constant 23 : index
    %c0_92 = arith.constant 0 : index
    %251 = vector.load %arg1[%c23, %c0_92] : memref<712x128xf32, #tpu.memory_space<vmem>>, vector<1x32xf32>
    %c24 = arith.constant 24 : index
    %c0_93 = arith.constant 0 : index
    %252 = vector.load %arg1[%c24, %c0_93] : memref<712x128xf32, #tpu.memory_space<vmem>>, vector<1x32xf32>
    %cst_94 = arith.constant dense<0.000000e+00> : vector<16xf32>
    %253 = vector.multi_reduction <add>, %250, %cst_94 [1] : vector<16x32xf32> to vector<16xf32>
    %254 = vector.shape_cast %253 : vector<16xf32> to vector<16x1xf32>
    %cst_95 = arith.constant 3.200000e+01 : f32
    %255 = vector.broadcast %cst_95 : f32 to vector<16x1xf32>
    %256 = arith.divf %254, %255 : vector<16x1xf32>
    %257 = vector.broadcast %256 : vector<16x1xf32> to vector<16x32xf32>
    %258 = arith.subf %250, %257 : vector<16x32xf32>
    %259 = arith.mulf %258, %258 : vector<16x32xf32>
    %cst_96 = arith.constant dense<0.000000e+00> : vector<16xf32>
    %260 = vector.multi_reduction <add>, %259, %cst_96 [1] : vector<16x32xf32> to vector<16xf32>
    %261 = vector.shape_cast %260 : vector<16xf32> to vector<16x1xf32>
    %cst_97 = arith.constant 3.200000e+01 : f32
    %262 = vector.broadcast %cst_97 : f32 to vector<16x1xf32>
    %263 = arith.divf %261, %262 : vector<16x1xf32>
    %264 = vector.broadcast %256 : vector<16x1xf32> to vector<16x32xf32>
    %265 = arith.subf %250, %264 : vector<16x32xf32>
    %cst_98 = arith.constant 9.99999974E-6 : f32
    %266 = vector.broadcast %cst_98 : f32 to vector<16x1xf32>
    %267 = arith.addf %263, %266 : vector<16x1xf32>
    %268 = math.rsqrt %267 : vector<16x1xf32>
    %269 = vector.broadcast %268 : vector<16x1xf32> to vector<16x32xf32>
    %270 = arith.mulf %265, %269 : vector<16x32xf32>
    %271 = vector.broadcast %251 : vector<1x32xf32> to vector<16x32xf32>
    %272 = arith.mulf %270, %271 : vector<16x32xf32>
    %273 = vector.broadcast %252 : vector<1x32xf32> to vector<16x32xf32>
    %274 = arith.addf %272, %273 : vector<16x32xf32>
    %c688 = arith.constant 688 : index
    %c0_99 = arith.constant 0 : index
    %275 = vector.load %arg1[%c688, %c0_99] : memref<712x128xf32, #tpu.memory_space<vmem>>, vector<8x16xf32>
    %cst_100 = arith.constant dense<0.000000e+00> : vector<8x32xf32>
    %276 = tpu.matmul %275, %274, %cst_100 {dimension_numbers = #tpu.dot_dimension_numbers<[1], [0], [0], [1], [0, 0, 1, 1], [], []>} : vector<8x16xf32>, vector<16x32xf32>, vector<8x32xf32> -> vector<8x32xf32>
    %c624 = arith.constant 624 : index
    %c0_101 = arith.constant 0 : index
    %277 = vector.load %arg1[%c624, %c0_101] : memref<712x128xf32, #tpu.memory_space<vmem>>, vector<32x16xf32>
    %cst_102 = arith.constant dense<0.000000e+00> : vector<8x16xf32>
    %278 = tpu.matmul %276, %277, %cst_102 {dimension_numbers = #tpu.dot_dimension_numbers<[1], [0], [0], [1], [0, 0, 1, 1], [], []>} : vector<8x32xf32>, vector<32x16xf32>, vector<8x16xf32> -> vector<8x16xf32>
    %c25 = arith.constant 25 : index
    %c0_103 = arith.constant 0 : index
    %279 = vector.load %arg1[%c25, %c0_103] : memref<712x128xf32, #tpu.memory_space<vmem>>, vector<1x16xf32>
    %280 = vector.broadcast %279 : vector<1x16xf32> to vector<8x16xf32>
    %281 = arith.addf %278, %280 : vector<8x16xf32>
    %cst_104 = arith.constant 0.000000e+00 : f32
    %282 = vector.broadcast %cst_104 : f32 to vector<8x16xf32>
    %283 = arith.maximumf %281, %282 : vector<8x16xf32>
    %c704 = arith.constant 704 : index
    %c0_105 = arith.constant 0 : index
    %284 = vector.load %arg1[%c704, %c0_105] : memref<712x128xf32, #tpu.memory_space<vmem>>, vector<1x16xf32>
    %c705 = arith.constant 705 : index
    %c0_106 = arith.constant 0 : index
    %285 = vector.load %arg1[%c705, %c0_106] : memref<712x128xf32, #tpu.memory_space<vmem>>, vector<1x16xf32>
    %286 = vector.broadcast %284 : vector<1x16xf32> to vector<8x16xf32>
    %287 = arith.mulf %283, %286 : vector<8x16xf32>
    %cst_107 = arith.constant dense<0.000000e+00> : vector<8xf32>
    %288 = vector.multi_reduction <add>, %287, %cst_107 [1] : vector<8x16xf32> to vector<8xf32>
    %289 = vector.shape_cast %288 : vector<8xf32> to vector<8x1xf32>
    %cst_108 = arith.constant 1.250000e-01 : f32
    %290 = vector.broadcast %cst_108 : f32 to vector<8x1xf32>
    %291 = arith.mulf %289, %290 : vector<8x1xf32>
    %292 = vector.broadcast %291 : vector<8x1xf32> to vector<8x16xf32>
    %293 = arith.subf %283, %292 : vector<8x16xf32>
    %294 = arith.mulf %293, %293 : vector<8x16xf32>
    %295 = vector.broadcast %284 : vector<1x16xf32> to vector<8x16xf32>
    %296 = arith.mulf %294, %295 : vector<8x16xf32>
    %cst_109 = arith.constant dense<0.000000e+00> : vector<8xf32>
    %297 = vector.multi_reduction <add>, %296, %cst_109 [1] : vector<8x16xf32> to vector<8xf32>
    %298 = vector.shape_cast %297 : vector<8xf32> to vector<8x1xf32>
    %cst_110 = arith.constant 1.250000e-01 : f32
    %299 = vector.broadcast %cst_110 : f32 to vector<8x1xf32>
    %300 = arith.mulf %298, %299 : vector<8x1xf32>
    %cst_111 = arith.constant 9.99999974E-6 : f32
    %301 = vector.broadcast %cst_111 : f32 to vector<8x1xf32>
    %302 = arith.addf %300, %301 : vector<8x1xf32>
    %303 = math.rsqrt %302 : vector<8x1xf32>
    %304 = vector.broadcast %303 : vector<8x1xf32> to vector<8x16xf32>
    %305 = arith.mulf %293, %304 : vector<8x16xf32>
    %306 = vector.broadcast %284 : vector<1x16xf32> to vector<8x16xf32>
    %307 = arith.mulf %306, %305 : vector<8x16xf32>
    %308 = vector.broadcast %285 : vector<1x16xf32> to vector<8x16xf32>
    %309 = arith.mulf %283, %308 : vector<8x16xf32>
    %cst_112 = arith.constant dense<0.000000e+00> : vector<8xf32>
    %310 = vector.multi_reduction <add>, %309, %cst_112 [1] : vector<8x16xf32> to vector<8xf32>
    %311 = vector.shape_cast %310 : vector<8xf32> to vector<8x1xf32>
    %cst_113 = arith.constant 1.250000e-01 : f32
    %312 = vector.broadcast %cst_113 : f32 to vector<8x1xf32>
    %313 = arith.mulf %311, %312 : vector<8x1xf32>
    %314 = vector.broadcast %313 : vector<8x1xf32> to vector<8x16xf32>
    %315 = arith.subf %283, %314 : vector<8x16xf32>
    %316 = arith.mulf %315, %315 : vector<8x16xf32>
    %317 = vector.broadcast %285 : vector<1x16xf32> to vector<8x16xf32>
    %318 = arith.mulf %316, %317 : vector<8x16xf32>
    %cst_114 = arith.constant dense<0.000000e+00> : vector<8xf32>
    %319 = vector.multi_reduction <add>, %318, %cst_114 [1] : vector<8x16xf32> to vector<8xf32>
    %320 = vector.shape_cast %319 : vector<8xf32> to vector<8x1xf32>
    %cst_115 = arith.constant 1.250000e-01 : f32
    %321 = vector.broadcast %cst_115 : f32 to vector<8x1xf32>
    %322 = arith.mulf %320, %321 : vector<8x1xf32>
    %cst_116 = arith.constant 9.99999974E-6 : f32
    %323 = vector.broadcast %cst_116 : f32 to vector<8x1xf32>
    %324 = arith.addf %322, %323 : vector<8x1xf32>
    %325 = math.rsqrt %324 : vector<8x1xf32>
    %326 = vector.broadcast %325 : vector<8x1xf32> to vector<8x16xf32>
    %327 = arith.mulf %315, %326 : vector<8x16xf32>
    %328 = vector.broadcast %285 : vector<1x16xf32> to vector<8x16xf32>
    %329 = arith.mulf %328, %327 : vector<8x16xf32>
    %330 = arith.addf %307, %329 : vector<8x16xf32>
    %c26 = arith.constant 26 : index
    %c0_117 = arith.constant 0 : index
    %331 = vector.load %arg1[%c26, %c0_117] : memref<712x128xf32, #tpu.memory_space<vmem>>, vector<1x16xf32>
    %332 = vector.broadcast %331 : vector<1x16xf32> to vector<8x16xf32>
    %333 = arith.mulf %330, %332 : vector<8x16xf32>
    %c27 = arith.constant 27 : index
    %c0_118 = arith.constant 0 : index
    %334 = vector.load %arg1[%c27, %c0_118] : memref<712x128xf32, #tpu.memory_space<vmem>>, vector<1x16xf32>
    %335 = vector.broadcast %334 : vector<1x16xf32> to vector<8x16xf32>
    %336 = arith.addf %333, %335 : vector<8x16xf32>
    %c656 = arith.constant 656 : index
    %c0_119 = arith.constant 0 : index
    %337 = vector.load %arg1[%c656, %c0_119] : memref<712x128xf32, #tpu.memory_space<vmem>>, vector<16x128xf32>
    %cst_120 = arith.constant dense<0.000000e+00> : vector<8x128xf32>
    %338 = tpu.matmul %336, %337, %cst_120 {dimension_numbers = #tpu.dot_dimension_numbers<[1], [0], [0], [1], [0, 0, 1, 1], [], []>} : vector<8x16xf32>, vector<16x128xf32>, vector<8x128xf32> -> vector<8x128xf32>
    %c28 = arith.constant 28 : index
    %c0_121 = arith.constant 0 : index
    %339 = vector.load %arg1[%c28, %c0_121] : memref<712x128xf32, #tpu.memory_space<vmem>>, vector<1x128xf32>
    %340 = vector.broadcast %339 : vector<1x128xf32> to vector<8x128xf32>
    %341 = arith.addf %338, %340 : vector<8x128xf32>
    %c0_122 = arith.constant 0 : index
    %c0_123 = arith.constant 0 : index
    %342 = vector.load %arg2[%c0_122, %c0_123] : memref<8x128xf32, #tpu.memory_space<vmem>>, vector<8x128xf32>
    tpu.vector_store %arg2[%c0_122, %c0_123], %341 {strides = array<i32>} : memref<8x128xf32, #tpu.memory_space<vmem>>, vector<8x128xf32>,
    return
  }
}

</mosaic_0001>

<bundles_post_ra>
// kernel: ghostformer_forward.1
= control target key start
LH: loop header
LB: loop body
LE: loop exit
PB: predicated region body
PF: predicated region fallthrough
CT: control target
= control target key end

     0   :  { %7 = vsyncpa [#allocation3], 0  ;;  %s3335_s0 = inlined_call_operand.hbm [shape: f32[16,16], index: 0, kind: input, shape index: {}]   ;;  %s3336_s1 = inlined_call_operand.hbm [shape: f32[712,128], index: 1, kind: input, shape index: {}]   ;;  %s3337_s2 = inlined_call_operand.vmem [shape: f32[8,128], index: 2, kind: output, shape index: {}]  }
   0x1   :  { %8 = vsyncpa [#allocation5], 0  ;;  %s3102_s9 = smov [#allocation2]  }
   0x2   :  { %s14_s10 = sshll.u32 %s3102_s9, 4  ;;  %s15_s10 = int_to_ptr.vmem [resolvable:$true] %s14_s10 }
   0x3   :  { %s3066_s11 = scalar_lea.vmem %s15_s10, 256  ;;  %p3071_p1 = scmp.lt.s32.totalorder %s15_s10, %s15_s10 }
   0x4   :  { %p3067_p0 = scmp.ne.s32.totalorder %s15_s10, %s3066_s11  ;;  %p3072_p2 = scmp.lt.s32.totalorder %s3066_s11, %s3066_s11 }
   0x6   :  { %p3073_p3 = por %p3072_p2, %p3071_p1 }
   0x8   :  { %p3074_p4 = pnand %p3073_p3, %p3067_p0 }
   0xa   :  { %3077 = shalt.err (!%p3074_p4)
}
   0xb   :  { %s3103_s12 = smov 128   ;;  %s3104_s13 = smov 8  }
   0xc   :  { %20 = dma.hbm_to_vmem [thread:$0]  %s3335_s0, 256, %s15_s10, [#allocation3], %s3103_s12, %s3103_s12, %s3104_s13  }
   0xd   :  { %s3105_s16 = smov [#allocation4]  }
   0xe   :  { %s26_s17 = sshll.u32 %s3105_s16, 4  ;;  %s27_s17 = int_to_ptr.vmem [resolvable:$true] %s26_s17 }
   0xf   :  { %s3086_s18 = scalar_lea.vmem %s27_s17, 11392  ;;  %p3091_p6 = scmp.lt.s32.totalorder %s27_s17, %s27_s17 }
  0x10   :  { %p3087_p5 = scmp.ne.s32.totalorder %s27_s17, %s3086_s18  ;;  %p3092_p7 = scmp.lt.s32.totalorder %s3086_s18, %s3086_s18 }
  0x12   :  { %p3093_p8 = por %p3092_p7, %p3091_p6 }
  0x14   :  { %p3094_p9 = pnand %p3093_p8, %p3087_p5 }
  0x16   :  { %3097 = shalt.err (!%p3094_p9)
}
  0x17   :  { %32 = dma.hbm_to_vmem [thread:$0]  %s3336_s1, 11392, %s27_s17, [#allocation5], %s3103_s12, %s3103_s12, %s3104_s13  }
  0x18   :  { %3098 = dma.done.wait [#allocation3], 256  }
  0x19   :  { %3099 = vsyncadd [#allocation3], 4294967040 }
  0x1a   :  { %3100 = dma.done.wait [#allocation5], 11392  }
  0x1b   :  { %3101 = vsyncadd [#allocation5], 4294955904  ;;  %v60_v0 = vld [vmem:[#allocation4 + $0x28] sm:$0xff]  ;;  %v59_v1 = vld [vmem:[#allocation4 + $0x20] sm:$0xff]  ;;  %vm66_vm0 = vcmask 130048   ;;  %vm152_vm1 = vcmask 261120  }
  0x1c   :  { %v43_v2 = vld [vmem:[#allocation2] sm:$0xff]  ;;  %2728 = vmatprep.subr.mxu0 %v60_v0  ;;  %v44_v3 = vld [vmem:[#allocation2 + $0x8] sm:$0xff]  ;;  %v2503_v4 = vld [vmem:[#allocation4] ss:$0 sm:$0xff]  ;;  %vm3107_vm2 = vmmov 0  }
  0x1d   :  { %v2504_v5 = vld [vmem:[#allocation4 + $0x1] ss:$0 sm:$0xff]  ;;  %2729 = vmatpush3.msra.mxu0 %v60_v0  ;;  %v50_v6 = vmul.f32 %v2503_v4, %v43_v2  ;;  %v51_v7 = vmul.f32 %v2503_v4, %v44_v3  ;;  %v2505_v11 = vld [vmem:[#allocation4 + $0x2] ss:$0 sm:$0xff]  ;;  %v195_v29 = vld [vmem:[#allocation4 + $0x48] sm:$0xff] }
  0x1e   :  { %2730 = vmatprep.subr.mxu0 %v59_v1  ;;  %v203_v30 = vld [vmem:[#allocation4 + $0x88] sm:$0xff]  ;;  %v194_v31 = vld [vmem:[#allocation4 + $0x40] sm:$0xff]  ;;  %v193_v33 = vld [vmem:[#allocation4 + $0x38] sm:$0xff] }
  0x1f   :  { %2731 = vmatpush3.msra.mxu0 %v59_v1  ;;  %v57_v8 = vadd.f32 %v2504_v5, %v50_v6  ;;  %v58_v9 = vadd.f32 %v2504_v5, %v51_v7  ;;  %2757 = vmatprep.subr.mxu1 %v203_v30  ;;  %v202_v32 = vld [vmem:[#allocation4 + $0x80] sm:$0xff]  ;;  %v201_v34 = vld [vmem:[#allocation4 + $0x78] sm:$0xff]  ;;  %v192_v35 = vld [vmem:[#allocation4 + $0x30] sm:$0xff] }
  0x20   :  { %2735 = vmatprep.subr.mxu0 %v195_v29  ;;  %2758 = vmatpush3.msra.mxu1 %v203_v30  ;;  %v200_v36 = vld [vmem:[#allocation4 + $0x70] sm:$0xff]  ;;  %v199_v37 = vld [vmem:[#allocation4 + $0x68] sm:$0xff]  ;;  %v2508_v45 = vld [vmem:[#allocation4 + $0x3] ss:$0 sm:$0xff] }
  0x21   :  { %2732 = vmatprep.mubr.msk.f32.mxu0 %vm66_vm0, %v57_v8  ;;  %2759 = vmatprep.subr.mxu1 %v202_v32  ;;  %v2509_v47 = vld [vmem:[#allocation4 + $0x4] ss:$0 sm:$0xff]  ;;  %v197_v55 = vld [vmem:[#allocation4 + $0x58] sm:$0xff]  ;;  %v196_v56 = vld [vmem:[#allocation4 + $0x50] sm:$0xff] }
  0x22   :  { %2733 = vmatmul.mubr.msk.f32.vlgmr.msra.gmra.mxu0 %vm66_vm0, %v58_v9  ;;  %2760 = vmatpush3.msra.mxu1 %v202_v32  ;;  %v198_v54 = vld [vmem:[#allocation4 + $0x60] sm:$0xff]  ;;  %v3151_v61 = vld [vmem:[#allocation4 + $0x2b8] ss:$0 sm:$0xff]  ;;  %v3153_v62 = vld [vmem:[#allocation4 + $0x2b9] ss:$0 sm:$0xff] }
  0x23   :  { %2736 = vmatpush3.msra.mxu0 %v195_v29  ;;  %2761 = vmatprep.subr.mxu1 %v201_v34  ;;  %v2510_v59 = vld [vmem:[#allocation4 + $0x5] ss:$0 sm:$0xff]  ;;  %v2513_v1 = vld [vmem:[#allocation4 + $0x6] ss:$0 sm:$0xff]  ;;  %v2516_v3 = vld [vmem:[#allocation4 + $0x7] ss:$0 sm:$0xff] }
  0x24   :  { %2737 = vmatprep.subr.mxu0 %v194_v31  ;;  %2762 = vmatpush3.msra.mxu1 %v201_v34 }
  0x25   :  { %2738 = vmatpush3.msra.mxu0 %v194_v31  ;;  %2763 = vmatprep.subr.mxu1 %v200_v36 }
  0x26   :  { %2739 = vmatprep.subr.mxu0 %v193_v33  ;;  %2764 = vmatpush3.msra.mxu1 %v200_v36 }
  0x27   :  { %2740 = vmatpush3.msra.mxu0 %v193_v33 }
  0x28   :  { %2741 = vmatprep.subr.mxu0 %v192_v35 }
  0x29   :  { %2742 = vmatpush3.msra.mxu0 %v192_v35 }
  0x2a   :  { %2746 = vmatprep.subr.mxu0 %v199_v37 }
  0xe2   :  { %v2734_v10 = vpop.f32.mrf.mxu0 }
  0xe3   :  { %v145_v13 = vadd.f32 %v2734_v10, %v2505_v11 }
  0xe4   :  { %v139_v12 = vpop.f32.mrf.mxu0 }
  0xe5   :  { %v140_v14 = vadd.f32 %v2505_v11, %v139_v12  ;;  %v149_v16 = vmax.f32 %v145_v13, 0.0 }
  0xe7   :  { %v148_v15 = vmax.f32 %v140_v14, 0.0  ;;  %v156_v18 = vsel %vm152_vm1, %v149_v16, 0.0 }
  0xe9   :  { %v153_v17 = vsel %vm152_vm1, %v148_v15, 0.0 }
  0xea   :  { %154 = vadd.xlane.f32.xlu0 %v153_v17  ;;  %v3180_v17 = vld [vmem:[#allocation4 + $0x2a8] sm:$0xff] }
  0xee   :  { %157 = vadd.xlane.f32.xlu0 %v156_v18 }
 0x173   :  { %v155_v19 = vpop.xlane.xlu0 %154 }
 0x174   :  { %v160_v20 = vmul.f32 0.03125, %v155_v19 }
 0x176   :  { %v162_v21 = vsub.f32 %v148_v15, %v160_v20  ;;  %v3182_v20 = vld [vmem:[#allocation4 + $0x2a0] sm:$0xff] }
 0x177   :  { %v158_v22 = vpop.xlane.xlu0 %157 }
 0x178   :  { %v161_v23 = vmul.f32 0.03125, %v158_v22  ;;  %v164_v24 = vmul.f32 %v162_v21, %v162_v21 }
 0x17a   :  { %v163_v25 = vsub.f32 %v149_v16, %v161_v23  ;;  %v166_v26 = vsel %vm152_vm1, %v164_v24, 0.0 }
 0x17b   :  { %167 = vadd.xlane.f32.xlu1 %v166_v26 }
 0x17c   :  { %v165_v27 = vmul.f32 %v163_v25, %v163_v25 }
 0x17e   :  { %v169_v28 = vsel %vm152_vm1, %v165_v27, 0.0 }
 0x17f   :  { %170 = vadd.xlane.f32.xlu1 %v169_v28 }
 0x204   :  { %v168_v38 = vpop.xlane.xlu1 %167 }
 0x205   :  { %v172_v39 = vmul.f32 0.03125, %v168_v38 }
 0x207   :  { %v174_v40 = vadd.f32 1e-05, %v172_v39 }
 0x208   :  { %v171_v41 = vpop.xlane.xlu1 %170 }
 0x209   :  { %3002 = vrsqrt.f32 %v174_v40  ;;  %v173_v42 = vmul.f32 0.03125, %v171_v41 }
 0x20b   :  { %v175_v43 = vadd.f32 1e-05, %v173_v42 }
 0x20d   :  { %3004 = vrsqrt.f32 %v175_v43 }
 0x216   :  { %v3003_v44 = vpop.eup %3002 }
 0x217   :  { %v178_v46 = vmul.f32 %v3003_v44, %v162_v21 }
 0x219   :  { %v184_v48 = vmul.f32 %v2508_v45, %v178_v46 }
 0x21a   :  { %v3005_v49 = vpop.eup %3004 }
 0x21b   :  { %v179_v50 = vmul.f32 %v3005_v49, %v163_v25  ;;  %v3135_v51 = vadd.f32 %v2509_v47, %v184_v48 }
 0x21d   :  { %v185_v52 = vmul.f32 %v2508_v45, %v179_v50  ;;  %2743 = vmatprep.mubr.msk.f32.mxu0 %vm152_vm1, %v3135_v51  ;;  %2765 = vmatprep.mubr.msk.f32.mxu1 %vm152_vm1, %v3135_v51 }
 0x21f   :  { %v3141_v53 = vadd.f32 %v2509_v47, %v185_v52 }
 0x221   :  { %2744 = vmatmul.mubr.msk.f32.vlgmr.msra.gmra.mxu0 %vm152_vm1, %v3141_v53  ;;  %2766 = vmatmul.mubr.msk.f32.vlgmr.msra.gmra.mxu1 %vm152_vm1, %v3141_v53 }
 0x222   :  { %2747 = vmatpush3.msra.mxu0 %v199_v37  ;;  %2754 = vmatprep.mubr.msk.f32.mxu0 %vm152_vm1, %v3135_v51 }
 0x223   :  { %2748 = vmatprep.subr.mxu0 %v198_v54 }
 0x224   :  { %2749 = vmatpush3.msra.mxu0 %v198_v54 }
 0x225   :  { %2750 = vmatprep.subr.mxu0 %v197_v55 }
 0x226   :  { %2751 = vmatpush3.msra.mxu0 %v197_v55 }
 0x227   :  { %2752 = vmatprep.subr.mxu0 %v196_v56 }
 0x228   :  { %2753 = vmatpush3.msra.mxu0 %v196_v56 }
 0x229   :  { %2755 = vmatmul.mubr.msk.f32.vlgmr.msra.gmra.mxu0 %vm152_vm1, %v3141_v53 }
 0x2e1   :  { %v2745_v57 = vpop.f32.mrf.mxu0  ;;  %v2767_v2 = vpop.f32.mrf.mxu1 }
 0x2e2   :  { %v451_v7 = vadd.f32 %v2767_v2, %v2516_v3  ;;  %v291_v10 = vadd.f32 %v2745_v57, %v2510_v59 }
 0x2e3   :  { %v285_v58 = vpop.f32.mrf.mxu0  ;;  %v445_v9 = vpop.f32.mrf.mxu1 }
 0x2e4   :  { %v286_v60 = vadd.f32 %v2510_v59, %v285_v58  ;;  %v681_v11 = vmul.f32 %v3153_v62, %v451_v7  ;;  %v3166_v12 = vadd.f32 %v2516_v3, %v445_v9  ;;  %v459_v13 = vmul.f32 %v3151_v61, %v291_v10 }
 0x2e5   :  { %v576_v14 = vmul.f32 %v3153_v62, %v291_v10  ;;  %v3177_v16 = vmul.f32 %v3151_v61, %v451_v7  ;;  %v204_v7 = vld [vmem:[#allocation4 + $0x90] sm:$0xff] }
 0x2e6   :  { %v458_v63 = vmul.f32 %v3151_v61, %v286_v60  ;;  %v575_v0 = vmul.f32 %v3153_v62, %v286_v60  ;;  %v680_v15 = vmul.f32 %v3153_v62, %v3166_v12 }
 0x2e8   :  { %2772 = vmatprep.mubr.msk.f32.mxu0 %vm152_vm1, %v458_v63  ;;  %2779 = vmatprep.mubr.msk.f32.mxu1 %vm152_vm1, %v575_v0 }
 0x2e9   :  { %v2756_v4 = vpop.f32.mrf.mxu0 }
 0x2ea   :  { %v371_v5 = vadd.f32 %v2756_v4, %v2513_v1  ;;  %v207_v4 = vld [vmem:[#allocation4 + $0xa8] sm:$0xff] }
 0x2eb   :  { %v365_v6 = vpop.f32.mrf.mxu0 }
 0x2ec   :  { %v366_v8 = vadd.f32 %v2513_v1, %v365_v6  ;;  %2768 = vmatprep.subr.msk.mxu0 %vm152_vm1, %v371_v5  ;;  %2775 = vmatprep.subr.msk.mxu1 %vm152_vm1, %v371_v5  ;;  %v569_v1 = vmul.f32 %v3151_v61, %v3166_v12  ;;  %v205_v6 = vld [vmem:[#allocation4 + $0x98] sm:$0xff] }
 0x2ed   :  { %2769 = vmatpush3.xpose.msk.msra.mxu0 %vm152_vm1, %v371_v5  ;;  %2776 = vmatpush3.xpose.msk.msra.mxu1 %vm152_vm1, %v371_v5  ;;  %v206_v5 = vld [vmem:[#allocation4 + $0xa0] sm:$0xff] }
 0x2ee   :  { %2770 = vmatprep.subr.msk.mxu0 %vm152_vm1, %v366_v8  ;;  %2777 = vmatprep.subr.msk.mxu1 %vm152_vm1, %v366_v8 }
 0x2f1   :  { %2771 = vmatpush3.xpose.msk.msra.mxu0 %vm152_vm1, %v366_v8  ;;  %2778 = vmatpush3.xpose.msk.msra.mxu1 %vm152_vm1, %v366_v8 }
 0x2f2   :  { %2782 = vmatprep.subr.mxu0 %v681_v11  ;;  %2796 = vmatprep.subr.mxu1 %v207_v4 }
 0x2f4   :  { %2773 = vmatmul.mubr.msk.f32.vlgmr.msra.gmra.mxu0 %vm152_vm1, %v459_v13  ;;  %2780 = vmatmul.mubr.msk.f32.vlgmr.msra.gmra.mxu1 %vm152_vm1, %v576_v14  ;;  %v2533_v14 = vld [vmem:[#allocation4 + $0x8] ss:$0 sm:$0xff] }
 0x2f5   :  { %2783 = vmatpush3.msra.mxu0 %v681_v11  ;;  %2797 = vmatpush3.msra.mxu1 %v207_v4 }
 0x2f6   :  { %2784 = vmatprep.subr.mxu0 %v680_v15  ;;  %2798 = vmatprep.subr.mxu1 %v206_v5 }
 0x2f7   :  { %2785 = vmatpush3.msra.mxu0 %v680_v15  ;;  %2799 = vmatpush3.msra.mxu1 %v206_v5  ;;  %v979_v5 = vld [vmem:[#allocation4 + $0x188] sm:$0xff] }
 0x2f8   :  { %2789 = vmatprep.subr.mxu0 %v3177_v16  ;;  %2800 = vmatprep.subr.mxu1 %v205_v6 }
 0x2f9   :  { %2801 = vmatpush3.msra.mxu1 %v205_v6  ;;  %v978_v6 = vld [vmem:[#allocation4 + $0x180] sm:$0xff] }
 0x2fa   :  { %2802 = vmatprep.subr.mxu1 %v204_v7 }
 0x2fb   :  { %2803 = vmatpush3.msra.mxu1 %v204_v7  ;;  %v977_v7 = vld [vmem:[#allocation4 + $0x178] sm:$0xff] }
 0x3b4   :  { %v2774_v18 = vpop.f32.mrf.mxu0  ;;  %v2781_v19 = vpop.f32.mrf.mxu1 }
 0x3b5   :  { %v655_v21 = vadd.f32 %v2781_v19, %v3180_v17  ;;  %v544_v24 = vadd.f32 %v2774_v18, %v3180_v17 }
 0x3b6   :  { %v538_v22 = vpop.f32.mrf.mxu0  ;;  %v649_v23 = vpop.f32.mrf.mxu1 }
 0x3b7   :  { %v650_v25 = vadd.f32 %v649_v23, %v3182_v20  ;;  %v661_v26 = vsel %vm66_vm0, %v655_v21, -inf  ;;  %v539_v27 = vadd.f32 %v538_v22, %v3182_v20  ;;  %v550_v29 = vsel %vm66_vm0, %v544_v24, -inf }
 0x3b8   :  { %662 = vmax.xlane.f32.xlu1 %v661_v26 }
 0x3b9   :  { %v658_v28 = vsel %vm66_vm0, %v650_v25, -inf  ;;  %v547_v30 = vsel %vm66_vm0, %v539_v27, -inf }
 0x3ba   :  { %659 = vmax.xlane.f32.xlu0 %v658_v28 }
 0x3bc   :  { %551 = vmax.xlane.f32.xlu1 %v550_v29 }
 0x3be   :  { %548 = vmax.xlane.f32.xlu0 %v547_v30 }
 0x441   :  { %v663_v31 = vpop.xlane.xlu1 %662 }
 0x442   :  { %v665_v32 = vsub.f32 %v655_v21, %v663_v31 }
 0x443   :  { %v660_v33 = vpop.xlane.xlu0 %659 }
 0x444   :  { %v668_v34 = vmul.f32 1.442695, %v665_v32  ;;  %v664_v35 = vsub.f32 %v650_v25, %v660_v33  ;;  %v975_v33 = vld [vmem:[#allocation4 + $0x148] sm:$0xff] }
 0x445   :  { %v552_v36 = vpop.xlane.xlu1 %551 }
 0x446   :  { %3006 = vpow2.f32 %v668_v34  ;;  %v666_v37 = vmul.f32 1.442695, %v664_v35  ;;  %v554_v38 = vsub.f32 %v544_v24, %v552_v36  ;;  %v974_v34 = vld [vmem:[#allocation4 + $0x140] sm:$0xff]  ;;  %v973_v35 = vld [vmem:[#allocation4 + $0x138] sm:$0xff]  ;;  %v972_v36 = vld [vmem:[#allocation4 + $0x130] sm:$0xff] }
 0x447   :  { %v549_v39 = vpop.xlane.xlu0 %548 }
 0x448   :  { %3008 = vpow2.f32 %v666_v37  ;;  %v557_v40 = vmul.f32 1.442695, %v554_v38  ;;  %v553_v41 = vsub.f32 %v539_v27, %v549_v39  ;;  %v991_v37 = vld [vmem:[#allocation4 + $0x1e8] sm:$0xff]  ;;  %v990_v38 = vld [vmem:[#allocation4 + $0x1e0] sm:$0xff]  ;;  %v989_v39 = vld [vmem:[#allocation4 + $0x1d8] sm:$0xff] }
 0x449   :  { %2818 = vmatprep.subr.mxu1 %v991_v37 }
 0x44a   :  { %3010 = vpow2.f32 %v557_v40  ;;  %v555_v42 = vmul.f32 1.442695, %v553_v41  ;;  %v988_v40 = vld [vmem:[#allocation4 + $0x1d0] sm:$0xff]  ;;  %v987_v41 = vld [vmem:[#allocation4 + $0x1c8] sm:$0xff] }
 0x44c   :  { %3012 = vpow2.f32 %v555_v42  ;;  %v986_v42 = vld [vmem:[#allocation4 + $0x1c0] sm:$0xff] }
 0x453   :  { %v3007_v43 = vpop.eup %3006 }
 0x454   :  { %v673_v44 = vsel %vm66_vm0, %v3007_v43, 0.0 }
 0x455   :  { %v3009_v45 = vpop.eup %3008  ;;  %674 = vadd.xlane.f32.xlu1 %v673_v44  ;;  %v984_v44 = vld [vmem:[#allocation4 + $0x1b0] sm:$0xff] }
 0x456   :  { %v670_v46 = vsel %vm66_vm0, %v3009_v45, 0.0 }
 0x457   :  { %v3011_v47 = vpop.eup %3010  ;;  %671 = vadd.xlane.f32.xlu0 %v670_v46  ;;  %v982_v46 = vld [vmem:[#allocation4 + $0x1a0] sm:$0xff] }
 0x458   :  { %v562_v48 = vsel %vm66_vm0, %v3011_v47, 0.0 }
 0x459   :  { %v3013_v49 = vpop.eup %3012  ;;  %563 = vadd.xlane.f32.xlu1 %v562_v48  ;;  %v980_v48 = vld [vmem:[#allocation4 + $0x190] sm:$0xff] }
 0x45a   :  { %v559_v50 = vsel %vm66_vm0, %v3013_v49, 0.0 }
 0x45b   :  { %560 = vadd.xlane.f32.xlu0 %v559_v50 }
 0x4de   :  { %v675_v52 = vpop.xlane.xlu1 %674 }
 0x4df   :  { %3014 = vrcp.f32 %v675_v52 }
 0x4e0   :  { %v672_v54 = vpop.xlane.xlu0 %671 }
 0x4e1   :  { %3016 = vrcp.f32 %v672_v54 }
 0x4e2   :  { %v564_v55 = vpop.xlane.xlu1 %563 }
 0x4e3   :  { %3018 = vrcp.f32 %v564_v55 }
 0x4e4   :  { %v561_v56 = vpop.xlane.xlu0 %560 }
 0x4e5   :  { %3020 = vrcp.f32 %v561_v56 }
 0x4ec   :  { %v3015_v57 = vpop.eup %3014 }
 0x4ed   :  { %v679_v60 = vmul.f32 %v3015_v57, %v3007_v43  ;;  %v985_v43 = vld [vmem:[#allocation4 + $0x1b8] sm:$0xff] }
 0x4ee   :  { %v3017_v58 = vpop.eup %3016 }
 0x4ef   :  { %v678_v59 = vmul.f32 %v3017_v58, %v3009_v45  ;;  %v983_v45 = vld [vmem:[#allocation4 + $0x1a8] sm:$0xff] }
 0x4f0   :  { %v3019_v63 = vpop.eup %3018  ;;  %v2536_v58 = vld [vmem:[#allocation4 + $0x9] ss:$0 sm:$0xff] }
 0x4f1   :  { %2786 = vmatprep.mubr.msk.f32.mxu0 %vm66_vm0, %v678_v59  ;;  %v568_v3 = vmul.f32 %v3019_v63, %v3011_v47  ;;  %v981_v47 = vld [vmem:[#allocation4 + $0x198] sm:$0xff] }
 0x4f2   :  { %v3021_v0 = vpop.eup %3020  ;;  %2787 = vmatmul.mubr.msk.f32.vlgmr.msra.gmra.mxu0 %vm66_vm0, %v679_v60 }
 0x4f3   :  { %2790 = vmatpush3.msra.mxu0 %v3177_v16  ;;  %v567_v2 = vmul.f32 %v3021_v0, %v3013_v49 }
 0x4f4   :  { %2791 = vmatprep.subr.mxu0 %v569_v1 }
 0x4f5   :  { %2792 = vmatpush3.msra.mxu0 %v569_v1  ;;  %2793 = vmatprep.mubr.msk.f32.mxu0 %vm66_vm0, %v567_v2  ;;  %v2537_v1 = vld [vmem:[#allocation4 + $0xa] ss:$0 sm:$0xff] }
 0x4f6   :  { %2794 = vmatmul.mubr.msk.f32.vlgmr.msra.gmra.mxu0 %vm66_vm0, %v568_v3  ;;  %2807 = vmatprep.subr.mxu0 %v975_v33 }
 0x4f7   :  { %2808 = vmatpush3.msra.mxu0 %v975_v33 }
 0x4f8   :  { %2809 = vmatprep.subr.mxu0 %v974_v34 }
 0x4f9   :  { %2810 = vmatpush3.msra.mxu0 %v974_v34 }
 0x4fa   :  { %2811 = vmatprep.subr.mxu0 %v973_v35 }
 0x4fb   :  { %2812 = vmatpush3.msra.mxu0 %v973_v35  ;;  %v1205_v35 = vld [vmem:[#allocation4 + $0xc8] sm:$0xff] }
 0x4fc   :  { %2813 = vmatprep.subr.mxu0 %v972_v36 }
 0x4fd   :  { %2814 = vmatpush3.msra.mxu0 %v972_v36  ;;  %v1204_v36 = vld [vmem:[#allocation4 + $0xc0] sm:$0xff] }
 0x4fe   :  { %2853 = vmatprep.subr.mxu0 %v1205_v35 }
 0x5b2   :  { %v2788_v8 = vpop.f32.mrf.mxu0 }
 0x5b4   :  { %v754_v9 = vpop.f32.mrf.mxu0 }
 0x5b6   :  { %v2795_v10 = vpop.f32.mrf.mxu0 }
 0x5b7   :  { %v841_v13 = vadd.f32 %v2795_v10, %v2788_v8  ;;  %v976_v8 = vld [vmem:[#allocation4 + $0x170] sm:$0xff] }
 0x5b8   :  { %v835_v11 = vpop.f32.mrf.mxu0 }
 0x5b9   :  { %v836_v12 = vadd.f32 %v835_v11, %v754_v9  ;;  %v2538_v9 = vld [vmem:[#allocation4 + $0xb] ss:$0 sm:$0xff] }
 0x5bb   :  { %2804 = vmatprep.mubr.msk.f32.mxu1 %vm152_vm1, %v836_v12 }
 0x5bc   :  { %2805 = vmatmul.mubr.msk.f32.vlgmr.msra.gmra.mxu1 %vm152_vm1, %v841_v13 }
 0x5bd   :  { %2819 = vmatpush3.msra.mxu1 %v991_v37  ;;  %v1203_v37 = vld [vmem:[#allocation4 + $0xb8] sm:$0xff] }
 0x5be   :  { %2820 = vmatprep.subr.mxu1 %v990_v38 }
 0x5bf   :  { %2821 = vmatpush3.msra.mxu1 %v990_v38  ;;  %v1202_v38 = vld [vmem:[#allocation4 + $0xb0] sm:$0xff] }
 0x5c0   :  { %2822 = vmatprep.subr.mxu1 %v989_v39 }
 0x5c1   :  { %2823 = vmatpush3.msra.mxu1 %v989_v39  ;;  %v1209_v39 = vld [vmem:[#allocation4 + $0xe8] sm:$0xff] }
 0x5c2   :  { %2824 = vmatprep.subr.mxu1 %v988_v40 }
 0x5c3   :  { %2825 = vmatpush3.msra.mxu1 %v988_v40 }
 0x5c4   :  { %2826 = vmatprep.subr.mxu1 %v987_v41 }
 0x5c5   :  { %2827 = vmatpush3.msra.mxu1 %v987_v41 }
 0x5c6   :  { %2828 = vmatprep.subr.mxu1 %v986_v42 }
 0x5c7   :  { %2829 = vmatpush3.msra.mxu1 %v986_v42 }
 0x5c8   :  { %2830 = vmatprep.subr.mxu1 %v985_v43 }
 0x5c9   :  { %2831 = vmatpush3.msra.mxu1 %v985_v43 }
 0x5ca   :  { %2832 = vmatprep.subr.mxu1 %v984_v44 }
 0x5cb   :  { %2833 = vmatpush3.msra.mxu1 %v984_v44 }
 0x5cc   :  { %2834 = vmatprep.subr.mxu1 %v983_v45 }
 0x5cd   :  { %2835 = vmatpush3.msra.mxu1 %v983_v45 }
 0x5ce   :  { %2836 = vmatprep.subr.mxu1 %v982_v46 }
 0x5cf   :  { %2837 = vmatpush3.msra.mxu1 %v982_v46 }
 0x5d0   :  { %2838 = vmatprep.subr.mxu1 %v981_v47 }
 0x5d1   :  { %2839 = vmatpush3.msra.mxu1 %v981_v47  ;;  %v2542_v47 = vld [vmem:[#allocation4 + $0xd] ss:$0 sm:$0xff] }
 0x5d2   :  { %2840 = vmatprep.subr.mxu1 %v980_v48 }
 0x5d3   :  { %2841 = vmatpush3.msra.mxu1 %v980_v48 }
 0x5d4   :  { %2842 = vmatprep.subr.mxu1 %v979_v5 }
 0x5d5   :  { %2843 = vmatpush3.msra.mxu1 %v979_v5 }
 0x5d6   :  { %2844 = vmatprep.subr.mxu1 %v978_v6 }
 0x5d7   :  { %2845 = vmatpush3.msra.mxu1 %v978_v6 }
 0x5d8   :  { %2846 = vmatprep.subr.mxu1 %v977_v7 }
 0x5d9   :  { %2847 = vmatpush3.msra.mxu1 %v977_v7 }
 0x5da   :  { %2848 = vmatprep.subr.mxu1 %v976_v8 }
 0x5db   :  { %2849 = vmatpush3.msra.mxu1 %v976_v8 }
 0x67c   :  { %v2806_v15 = vpop.f32.mrf.mxu1 }
 0x67d   :  { %v927_v16 = vadd.f32 %v2806_v15, %v2533_v14 }
 0x67e   :  { %v921_v18 = vpop.f32.mrf.mxu1 }
 0x67f   :  { %v922_v19 = vadd.f32 %v2533_v14, %v921_v18  ;;  %v931_v21 = vadd.f32 %v927_v16, %v3141_v53  ;;  %v2541_v16 = vld [vmem:[#allocation4 + $0xc] ss:$0 sm:$0xff] }
 0x681   :  { %v937_v22 = vsel %vm152_vm1, %v931_v21, 0.0  ;;  %v930_v23 = vadd.f32 %v922_v19, %v3135_v51 }
 0x682   :  { %938 = vadd.xlane.f32.xlu1 %v937_v22 }
 0x683   :  { %v934_v24 = vsel %vm152_vm1, %v930_v23, 0.0 }
 0x684   :  { %935 = vadd.xlane.f32.xlu0 %v934_v24 }
 0x70b   :  { %v939_v25 = vpop.xlane.xlu1 %938 }
 0x70c   :  { %v941_v26 = vmul.f32 0.03125, %v939_v25 }
 0x70d   :  { %v936_v27 = vpop.xlane.xlu0 %935 }
 0x70e   :  { %v3209_v28 = vsub.f32 %v931_v21, %v941_v26  ;;  %v940_v29 = vmul.f32 0.03125, %v936_v27 }
 0x710   :  { %v3211_v30 = vsub.f32 %v930_v23, %v940_v29  ;;  %v945_v31 = vmul.f32 %v3209_v28, %v3209_v28 }
 0x712   :  { %v949_v53 = vsel %vm152_vm1, %v945_v31, 0.0  ;;  %v944_v51 = vmul.f32 %v3211_v30, %v3211_v30 }
 0x713   :  { %950 = vadd.xlane.f32.xlu1 %v949_v53 }
 0x714   :  { %v946_v32 = vsel %vm152_vm1, %v944_v51, 0.0 }
 0x715   :  { %947 = vadd.xlane.f32.xlu0 %v946_v32 }
 0x79c   :  { %v951_v49 = vpop.xlane.xlu1 %950 }
 0x79d   :  { %v953_v50 = vmul.f32 0.03125, %v951_v49 }
 0x79e   :  { %v948_v52 = vpop.xlane.xlu0 %947 }
 0x79f   :  { %v955_v54 = vadd.f32 1e-05, %v953_v50  ;;  %v952_v55 = vmul.f32 0.03125, %v948_v52 }
 0x7a1   :  { %3022 = vrsqrt.f32 %v955_v54  ;;  %v954_v56 = vadd.f32 1e-05, %v952_v55  ;;  %v2543_v54 = vld [vmem:[#allocation4 + $0xe] ss:$0 sm:$0xff] }
 0x7a3   :  { %3024 = vrsqrt.f32 %v954_v56 }
 0x7ae   :  { %v3023_v57 = vpop.eup %3022 }
 0x7af   :  { %v959_v59 = vmul.f32 %v3023_v57, %v3209_v28 }
 0x7b0   :  { %v3025_v60 = vpop.eup %3024 }
 0x7b1   :  { %v958_v63 = vmul.f32 %v3025_v60, %v3211_v30  ;;  %v965_v0 = vmul.f32 %v2536_v58, %v959_v59  ;;  %v1207_v59 = vld [vmem:[#allocation4 + $0xd8] sm:$0xff]  ;;  %v1206_v60 = vld [vmem:[#allocation4 + $0xd0] sm:$0xff] }
 0x7b3   :  { %v964_v2 = vmul.f32 %v2536_v58, %v958_v63  ;;  %v971_v4 = vadd.f32 %v2537_v1, %v965_v0  ;;  %v1208_v58 = vld [vmem:[#allocation4 + $0xe0] sm:$0xff]  ;;  %v1213_v63 = vld [vmem:[#allocation4 + $0x108] sm:$0xff] }
 0x7b4   :  { %v1212_v0 = vld [vmem:[#allocation4 + $0x100] sm:$0xff] }
 0x7b5   :  { %v970_v3 = vadd.f32 %v2537_v1, %v964_v2  ;;  %v1211_v1 = vld [vmem:[#allocation4 + $0xf8] sm:$0xff]  ;;  %v1210_v2 = vld [vmem:[#allocation4 + $0xf0] sm:$0xff] }
 0x7b7   :  { %2815 = vmatprep.mubr.msk.f32.mxu0 %vm152_vm1, %v970_v3 }
 0x7b8   :  { %2816 = vmatmul.mubr.msk.f32.vlgmr.msra.gmra.mxu0 %vm152_vm1, %v971_v4 }
 0x7b9   :  { %2854 = vmatpush3.msra.mxu0 %v1205_v35 }
 0x7ba   :  { %2855 = vmatprep.subr.mxu0 %v1204_v36 }
 0x7bb   :  { %2856 = vmatpush3.msra.mxu0 %v1204_v36 }
 0x7bc   :  { %2857 = vmatprep.subr.mxu0 %v1203_v37 }
 0x7bd   :  { %2858 = vmatpush3.msra.mxu0 %v1203_v37 }
 0x7be   :  { %2859 = vmatprep.subr.mxu0 %v1202_v38 }
 0x7bf   :  { %2860 = vmatpush3.msra.mxu0 %v1202_v38 }
 0x7c0   :  { %2864 = vmatprep.subr.mxu0 %v1209_v39 }
 0x878   :  { %v2817_v10 = vpop.f32.mrf.mxu0 }
 0x879   :  { %v1075_v11 = vadd.f32 %v2817_v10, %v2538_v9 }
 0x87a   :  { %v1069_v12 = vpop.f32.mrf.mxu0 }
 0x87b   :  { %v1070_v13 = vadd.f32 %v2538_v9, %v1069_v12  ;;  %v1079_v15 = vmax.f32 %v1075_v11, 0.0  ;;  %v2547_v9 = vld [vmem:[#allocation4 + $0x10] ss:$0 sm:$0xff] }
 0x87d   :  { %v1078_v14 = vmax.f32 %v1070_v13, 0.0 }
 0x87f   :  { %2850 = vmatprep.mubr.f32.mxu1 %v1078_v14 }
 0x880   :  { %2851 = vmatmul.mubr.f32.vlgmr.msra.gmra.mxu1 %v1079_v15  ;;  %v2550_v15 = vld [vmem:[#allocation4 + $0x11] ss:$0 sm:$0xff] }
 0x940   :  { %v2852_v18 = vpop.f32.mrf.mxu1 }
 0x941   :  { %v1157_v19 = vadd.f32 %v2852_v18, %v2541_v16 }
 0x942   :  { %v1151_v21 = vpop.f32.mrf.mxu1 }
 0x943   :  { %v1152_v22 = vadd.f32 %v2541_v16, %v1151_v21  ;;  %v1161_v23 = vadd.f32 %v1157_v19, %v971_v4  ;;  %v2544_v4 = vld [vmem:[#allocation4 + $0xf] ss:$0 sm:$0xff] }
 0x945   :  { %v1167_v24 = vsel %vm152_vm1, %v1161_v23, 0.0  ;;  %v1160_v25 = vadd.f32 %v1152_v22, %v970_v3 }
 0x946   :  { %1168 = vadd.xlane.f32.xlu1 %v1167_v24 }
 0x947   :  { %v1164_v26 = vsel %vm152_vm1, %v1160_v25, 0.0 }
 0x948   :  { %1165 = vadd.xlane.f32.xlu0 %v1164_v26 }
 0x9cf   :  { %v1169_v27 = vpop.xlane.xlu1 %1168 }
 0x9d0   :  { %v1171_v28 = vmul.f32 0.03125, %v1169_v27 }
 0x9d1   :  { %v1166_v29 = vpop.xlane.xlu0 %1165 }
 0x9d2   :  { %v1173_v30 = vsub.f32 %v1161_v23, %v1171_v28  ;;  %v1170_v31 = vmul.f32 0.03125, %v1166_v29 }
 0x9d4   :  { %v1172_v53 = vsub.f32 %v1160_v25, %v1170_v31  ;;  %v1175_v51 = vmul.f32 %v1173_v30, %v1173_v30 }
 0x9d6   :  { %v1179_v32 = vsel %vm152_vm1, %v1175_v51, 0.0  ;;  %v1174_v33 = vmul.f32 %v1172_v53, %v1172_v53 }
 0x9d7   :  { %1180 = vadd.xlane.f32.xlu1 %v1179_v32 }
 0x9d8   :  { %v1176_v34 = vsel %vm152_vm1, %v1174_v33, 0.0 }
 0x9d9   :  { %1177 = vadd.xlane.f32.xlu0 %v1176_v34 }
 0xa60   :  { %v1181_v40 = vpop.xlane.xlu1 %1180 }
 0xa61   :  { %v1183_v41 = vmul.f32 0.03125, %v1181_v40 }
 0xa62   :  { %v1178_v42 = vpop.xlane.xlu0 %1177 }
 0xa63   :  { %v1185_v43 = vadd.f32 1e-05, %v1183_v41  ;;  %v1182_v44 = vmul.f32 0.03125, %v1178_v42 }
 0xa65   :  { %3026 = vrsqrt.f32 %v1185_v43  ;;  %v1184_v45 = vadd.f32 1e-05, %v1182_v44 }
 0xa67   :  { %3028 = vrsqrt.f32 %v1184_v45 }
 0xa72   :  { %v3027_v46 = vpop.eup %3026 }
 0xa73   :  { %v1189_v48 = vmul.f32 %v3027_v46, %v1173_v30 }
 0xa74   :  { %v3029_v49 = vpop.eup %3028 }
 0xa75   :  { %v1188_v50 = vmul.f32 %v3029_v49, %v1172_v53  ;;  %v1195_v52 = vmul.f32 %v2542_v47, %v1189_v48 }
 0xa77   :  { %v1194_v55 = vmul.f32 %v2542_v47, %v1188_v50  ;;  %v3229_v57 = vadd.f32 %v2543_v54, %v1195_v52 }
 0xa79   :  { %v3227_v56 = vadd.f32 %v2543_v54, %v1194_v55 }
 0xa7b   :  { %2861 = vmatprep.mubr.msk.f32.mxu0 %vm152_vm1, %v3227_v56 }
 0xa7c   :  { %2862 = vmatmul.mubr.msk.f32.vlgmr.msra.gmra.mxu0 %vm152_vm1, %v3229_v57 }
 0xa7d   :  { %2865 = vmatpush3.msra.mxu0 %v1209_v39  ;;  %2872 = vmatprep.mubr.msk.f32.mxu0 %vm152_vm1, %v3227_v56 }
 0xa7e   :  { %2866 = vmatprep.subr.mxu0 %v1208_v58 }
 0xa7f   :  { %2867 = vmatpush3.msra.mxu0 %v1208_v58 }
 0xa80   :  { %2868 = vmatprep.subr.mxu0 %v1207_v59 }
 0xa81   :  { %2869 = vmatpush3.msra.mxu0 %v1207_v59 }
 0xa82   :  { %2870 = vmatprep.subr.mxu0 %v1206_v60 }
 0xa83   :  { %2871 = vmatpush3.msra.mxu0 %v1206_v60 }
 0xa84   :  { %2873 = vmatmul.mubr.msk.f32.vlgmr.msra.gmra.mxu0 %vm152_vm1, %v3229_v57  ;;  %2875 = vmatprep.subr.mxu0 %v1213_v63 }
 0xa85   :  { %2876 = vmatpush3.msra.mxu0 %v1213_v63  ;;  %2883 = vmatprep.mubr.msk.f32.mxu0 %vm152_vm1, %v3227_v56 }
 0xa86   :  { %2877 = vmatprep.subr.mxu0 %v1212_v0 }
 0xa87   :  { %2878 = vmatpush3.msra.mxu0 %v1212_v0 }
 0xa88   :  { %2879 = vmatprep.subr.mxu0 %v1211_v1 }
 0xa89   :  { %2880 = vmatpush3.msra.mxu0 %v1211_v1 }
 0xa8a   :  { %2881 = vmatprep.subr.mxu0 %v1210_v2 }
 0xa8b   :  { %2882 = vmatpush3.msra.mxu0 %v1210_v2 }
 0xa8c   :  { %2884 = vmatmul.mubr.msk.f32.vlgmr.msra.gmra.mxu0 %vm152_vm1, %v3229_v57 }
 0xb3c   :  { %v2863_v3 = vpop.f32.mrf.mxu0 }
 0xb3d   :  { %v1301_v14 = vadd.f32 %v2863_v3, %v2544_v4 }
 0xb3e   :  { %v1295_v5 = vpop.f32.mrf.mxu0 }
 0xb3f   :  { %v1296_v6 = vadd.f32 %v2544_v4, %v1295_v5  ;;  %v1465_v18 = vmul.f32 %v3151_v61, %v1301_v14  ;;  %v1578_v19 = vmul.f32 %v3153_v62, %v1301_v14 }
 0xb41   :  { %v1464_v7 = vmul.f32 %v3151_v61, %v1296_v6  ;;  %v1577_v8 = vmul.f32 %v3153_v62, %v1296_v6 }
 0xb43   :  { %2890 = vmatprep.mubr.msk.f32.mxu0 %vm152_vm1, %v1464_v7  ;;  %2897 = vmatprep.mubr.msk.f32.mxu1 %vm152_vm1, %v1577_v8 }
 0xb44   :  { %v2874_v10 = vpop.f32.mrf.mxu0 }
 0xb45   :  { %v1381_v11 = vadd.f32 %v2874_v10, %v2547_v9  ;;  %v1216_v10 = vld [vmem:[#allocation4 + $0x120] sm:$0xff] }
 0xb46   :  { %v1375_v12 = vpop.f32.mrf.mxu0 }
 0xb47   :  { %v1376_v13 = vadd.f32 %v2547_v9, %v1375_v12  ;;  %2886 = vmatprep.subr.msk.mxu0 %vm152_vm1, %v1381_v11  ;;  %2893 = vmatprep.subr.msk.mxu1 %vm152_vm1, %v1381_v11  ;;  %v1217_v9 = vld [vmem:[#allocation4 + $0x128] sm:$0xff] }
 0xb48   :  { %2887 = vmatpush3.xpose.msk.msra.mxu0 %vm152_vm1, %v1381_v11  ;;  %2894 = vmatpush3.xpose.msk.msra.mxu1 %vm152_vm1, %v1381_v11  ;;  %v1215_v11 = vld [vmem:[#allocation4 + $0x118] sm:$0xff] }
 0xb49   :  { %2888 = vmatprep.subr.msk.mxu0 %vm152_vm1, %v1376_v13  ;;  %2895 = vmatprep.subr.msk.mxu1 %vm152_vm1, %v1376_v13 }
 0xb4c   :  { %v2885_v16 = vpop.f32.mrf.mxu0  ;;  %2889 = vmatpush3.xpose.msk.msra.mxu0 %vm152_vm1, %v1376_v13  ;;  %2896 = vmatpush3.xpose.msk.msra.mxu1 %vm152_vm1, %v1376_v13 }
 0xb4d   :  { %v1461_v21 = vadd.f32 %v2885_v16, %v2550_v15  ;;  %2914 = vmatprep.subr.mxu1 %v1217_v9 }
 0xb4e   :  { %v1455_v22 = vpop.f32.mrf.mxu0 }
 0xb4f   :  { %v1683_v23 = vmul.f32 %v3153_v62, %v1461_v21  ;;  %v3258_v24 = vadd.f32 %v2550_v15, %v1455_v22  ;;  %2891 = vmatmul.mubr.msk.f32.vlgmr.msra.gmra.mxu0 %vm152_vm1, %v1465_v18  ;;  %2898 = vmatmul.mubr.msk.f32.vlgmr.msra.gmra.mxu1 %vm152_vm1, %v1578_v19  ;;  %v3265_v26 = vmul.f32 %v3151_v61, %v1461_v21  ;;  %v2565_v19 = vld [vmem:[#allocation4 + $0x12] ss:$0 sm:$0xff] }
 0xb50   :  { %2915 = vmatpush3.msra.mxu1 %v1217_v9  ;;  %v1978_v9 = vld [vmem:[#allocation4 + $0x1f0] sm:$0xff] }
 0xb51   :  { %v1682_v25 = vmul.f32 %v3153_v62, %v3258_v24  ;;  %2900 = vmatprep.subr.mxu0 %v1683_v23  ;;  %v1575_v6 = vmul.f32 %v3151_v61, %v3258_v24  ;;  %2916 = vmatprep.subr.mxu1 %v1216_v10  ;;  %v1214_v61 = vld [vmem:[#allocation4 + $0x110] sm:$0xff] }
 0xb52   :  { %2901 = vmatpush3.msra.mxu0 %v1683_v23  ;;  %2917 = vmatpush3.msra.mxu1 %v1216_v10  ;;  %v2570_v10 = vld [vmem:[#allocation4 + $0x15] ss:$0 sm:$0xff] }
 0xb53   :  { %2902 = vmatprep.subr.mxu0 %v1682_v25  ;;  %2918 = vmatprep.subr.mxu1 %v1215_v11 }
 0xb54   :  { %2903 = vmatpush3.msra.mxu0 %v1682_v25  ;;  %2919 = vmatpush3.msra.mxu1 %v1215_v11 }
 0xb55   :  { %2907 = vmatprep.subr.mxu0 %v3265_v26  ;;  %2920 = vmatprep.subr.mxu1 %v1214_v61 }
 0xb56   :  { %2921 = vmatpush3.msra.mxu1 %v1214_v61 }
 0xc0f   :  { %v2892_v27 = vpop.f32.mrf.mxu0  ;;  %v2899_v28 = vpop.f32.mrf.mxu1 }
 0xc10   :  { %v1657_v29 = vadd.f32 %v2899_v28, %v3180_v17  ;;  %v1550_v53 = vadd.f32 %v2892_v27, %v3180_v17 }
 0xc11   :  { %v1544_v30 = vpop.f32.mrf.mxu0  ;;  %v1651_v31 = vpop.f32.mrf.mxu1 }
 0xc12   :  { %v1652_v51 = vadd.f32 %v1651_v31, %v3182_v20  ;;  %v1663_v62 = vsel %vm66_vm0, %v1657_v29, -inf  ;;  %v1545_v32 = vadd.f32 %v1544_v30, %v3182_v20  ;;  %v1556_v34 = vsel %vm66_vm0, %v1550_v53, -inf }
 0xc13   :  { %1664 = vmax.xlane.f32.xlu1 %v1663_v62 }
 0xc14   :  { %v1660_v33 = vsel %vm66_vm0, %v1652_v51, -inf  ;;  %v1553_v35 = vsel %vm66_vm0, %v1545_v32, -inf }
 0xc15   :  { %1661 = vmax.xlane.f32.xlu0 %v1660_v33 }
 0xc17   :  { %1557 = vmax.xlane.f32.xlu1 %v1556_v34  ;;  %v1977_v34 = vld [vmem:[#allocation4 + $0x168] sm:$0xff] }
 0xc19   :  { %1554 = vmax.xlane.f32.xlu0 %v1553_v35  ;;  %v1976_v35 = vld [vmem:[#allocation4 + $0x160] sm:$0xff] }
 0xc9c   :  { %v1665_v36 = vpop.xlane.xlu1 %1664 }
 0xc9d   :  { %v1667_v37 = vsub.f32 %v1657_v29, %v1665_v36  ;;  %v1975_v36 = vld [vmem:[#allocation4 + $0x158] sm:$0xff] }
 0xc9e   :  { %v1662_v38 = vpop.xlane.xlu0 %1661 }
 0xc9f   :  { %v1670_v17 = vmul.f32 1.442695, %v1667_v37  ;;  %v1666_v39 = vsub.f32 %v1652_v51, %v1662_v38  ;;  %v1974_v37 = vld [vmem:[#allocation4 + $0x150] sm:$0xff]  ;;  %v1993_v38 = vld [vmem:[#allocation4 + $0x268] sm:$0xff] }
 0xca0   :  { %v1558_v40 = vpop.xlane.xlu1 %1557  ;;  %2936 = vmatprep.subr.mxu1 %v1993_v38 }
 0xca1   :  { %3030 = vpow2.f32 %v1670_v17  ;;  %v1668_v41 = vmul.f32 1.442695, %v1666_v39  ;;  %v1560_v42 = vsub.f32 %v1550_v53, %v1558_v40  ;;  %v1992_v17 = vld [vmem:[#allocation4 + $0x260] sm:$0xff]  ;;  %v1991_v39 = vld [vmem:[#allocation4 + $0x258] sm:$0xff]  ;;  %v1990_v40 = vld [vmem:[#allocation4 + $0x250] sm:$0xff] }
 0xca2   :  { %v1555_v43 = vpop.xlane.xlu0 %1554 }
 0xca3   :  { %3032 = vpow2.f32 %v1668_v41  ;;  %v1563_v20 = vmul.f32 1.442695, %v1560_v42  ;;  %v1559_v44 = vsub.f32 %v1545_v32, %v1555_v43  ;;  %v1989_v41 = vld [vmem:[#allocation4 + $0x248] sm:$0xff]  ;;  %v1988_v42 = vld [vmem:[#allocation4 + $0x240] sm:$0xff]  ;;  %v1987_v43 = vld [vmem:[#allocation4 + $0x238] sm:$0xff] }
 0xca5   :  { %3034 = vpow2.f32 %v1563_v20  ;;  %v1561_v45 = vmul.f32 1.442695, %v1559_v44  ;;  %v1986_v20 = vld [vmem:[#allocation4 + $0x230] sm:$0xff]  ;;  %v1985_v44 = vld [vmem:[#allocation4 + $0x228] sm:$0xff] }
 0xca7   :  { %3036 = vpow2.f32 %v1561_v45  ;;  %v1984_v45 = vld [vmem:[#allocation4 + $0x220] sm:$0xff] }
 0xcae   :  { %v3031_v46 = vpop.eup %3030 }
 0xcaf   :  { %v1675_v47 = vsel %vm66_vm0, %v3031_v46, 0.0 }
 0xcb0   :  { %v3033_v48 = vpop.eup %3032  ;;  %1676 = vadd.xlane.f32.xlu1 %v1675_v47  ;;  %v1982_v47 = vld [vmem:[#allocation4 + $0x210] sm:$0xff] }
 0xcb1   :  { %v1672_v49 = vsel %vm66_vm0, %v3033_v48, 0.0 }
 0xcb2   :  { %v3035_v50 = vpop.eup %3034  ;;  %1673 = vadd.xlane.f32.xlu0 %v1672_v49 }
 0xcb3   :  { %v1568_v52 = vsel %vm66_vm0, %v3035_v50, 0.0 }
 0xcb4   :  { %v3037_v54 = vpop.eup %3036  ;;  %1569 = vadd.xlane.f32.xlu1 %v1568_v52 }
 0xcb5   :  { %v1565_v55 = vsel %vm66_vm0, %v3037_v54, 0.0 }
 0xcb6   :  { %1566 = vadd.xlane.f32.xlu0 %v1565_v55 }
 0xd39   :  { %v1677_v58 = vpop.xlane.xlu1 %1676 }
 0xd3a   :  { %3038 = vrcp.f32 %v1677_v58 }
 0xd3b   :  { %v1674_v59 = vpop.xlane.xlu0 %1673 }
 0xd3c   :  { %3040 = vrcp.f32 %v1674_v59  ;;  %v2568_v59 = vld [vmem:[#allocation4 + $0x13] ss:$0 sm:$0xff] }
 0xd3d   :  { %v1570_v60 = vpop.xlane.xlu1 %1569 }
 0xd3e   :  { %3042 = vrcp.f32 %v1570_v60 }
 0xd3f   :  { %v1567_v63 = vpop.xlane.xlu0 %1566 }
 0xd40   :  { %3044 = vrcp.f32 %v1567_v63 }
 0xd47   :  { %v3039_v0 = vpop.eup %3038 }
 0xd48   :  { %v1681_v3 = vmul.f32 %v3039_v0, %v3031_v46  ;;  %v1983_v46 = vld [vmem:[#allocation4 + $0x218] sm:$0xff] }
 0xd49   :  { %v3041_v1 = vpop.eup %3040 }
 0xd4a   :  { %v1680_v2 = vmul.f32 %v3041_v1, %v3033_v48 }
 0xd4b   :  { %v3043_v4 = vpop.eup %3042 }
 0xd4c   :  { %2904 = vmatprep.mubr.msk.f32.mxu0 %vm66_vm0, %v1680_v2  ;;  %v1574_v8 = vmul.f32 %v3043_v4, %v3035_v50  ;;  %v2569_v2 = vld [vmem:[#allocation4 + $0x14] ss:$0 sm:$0xff] }
 0xd4d   :  { %v3045_v5 = vpop.eup %3044  ;;  %2905 = vmatmul.mubr.msk.f32.vlgmr.msra.gmra.mxu0 %vm66_vm0, %v1681_v3 }
 0xd4e   :  { %2908 = vmatpush3.msra.mxu0 %v3265_v26  ;;  %v1573_v7 = vmul.f32 %v3045_v5, %v3037_v54 }
 0xd4f   :  { %2909 = vmatprep.subr.mxu0 %v1575_v6 }
 0xd50   :  { %2910 = vmatpush3.msra.mxu0 %v1575_v6  ;;  %2911 = vmatprep.mubr.msk.f32.mxu0 %vm66_vm0, %v1573_v7  ;;  %v1981_v6 = vld [vmem:[#allocation4 + $0x208] sm:$0xff]  ;;  %v1980_v7 = vld [vmem:[#allocation4 + $0x200] sm:$0xff] }
 0xd51   :  { %2912 = vmatmul.mubr.msk.f32.vlgmr.msra.gmra.mxu0 %vm66_vm0, %v1574_v8  ;;  %2925 = vmatprep.subr.mxu0 %v1977_v34  ;;  %v1979_v8 = vld [vmem:[#allocation4 + $0x1f8] sm:$0xff] }
 0xd52   :  { %2926 = vmatpush3.msra.mxu0 %v1977_v34 }
 0xd53   :  { %2927 = vmatprep.subr.mxu0 %v1976_v35 }
 0xd54   :  { %2928 = vmatpush3.msra.mxu0 %v1976_v35 }
 0xd55   :  { %2929 = vmatprep.subr.mxu0 %v1975_v36 }
 0xd56   :  { %2930 = vmatpush3.msra.mxu0 %v1975_v36 }
 0xd57   :  { %2931 = vmatprep.subr.mxu0 %v1974_v37 }
 0xd58   :  { %2932 = vmatpush3.msra.mxu0 %v1974_v37 }
 0xe0d   :  { %v2906_v12 = vpop.f32.mrf.mxu0 }
 0xe0f   :  { %v1756_v13 = vpop.f32.mrf.mxu0 }
 0xe11   :  { %v2913_v14 = vpop.f32.mrf.mxu0 }
 0xe12   :  { %v1843_v18 = vadd.f32 %v2913_v14, %v2906_v12 }
 0xe13   :  { %v1837_v15 = vpop.f32.mrf.mxu0 }
 0xe14   :  { %v1838_v16 = vadd.f32 %v1837_v15, %v1756_v13 }
 0xe16   :  { %2922 = vmatprep.mubr.msk.f32.mxu1 %vm152_vm1, %v1838_v16  ;;  %v2573_v16 = vld [vmem:[#allocation4 + $0x16] ss:$0 sm:$0xff] }
 0xe17   :  { %2923 = vmatmul.mubr.msk.f32.vlgmr.msra.gmra.mxu1 %vm152_vm1, %v1843_v18 }
 0xe18   :  { %2937 = vmatpush3.msra.mxu1 %v1993_v38 }
 0xe19   :  { %2938 = vmatprep.subr.mxu1 %v1992_v17 }
 0xe1a   :  { %2939 = vmatpush3.msra.mxu1 %v1992_v17 }
 0xe1b   :  { %2940 = vmatprep.subr.mxu1 %v1991_v39 }
 0xe1c   :  { %2941 = vmatpush3.msra.mxu1 %v1991_v39  ;;  %v2574_v39 = vld [vmem:[#allocation4 + $0x17] ss:$0 sm:$0xff] }
 0xe1d   :  { %2942 = vmatprep.subr.mxu1 %v1990_v40 }
 0xe1e   :  { %2943 = vmatpush3.msra.mxu1 %v1990_v40 }
 0xe1f   :  { %2944 = vmatprep.subr.mxu1 %v1989_v41 }
 0xe20   :  { %2945 = vmatpush3.msra.mxu1 %v1989_v41 }
 0xe21   :  { %2946 = vmatprep.subr.mxu1 %v1988_v42 }
 0xe22   :  { %2947 = vmatpush3.msra.mxu1 %v1988_v42  ;;  %v2575_v42 = vld [vmem:[#allocation4 + $0x18] ss:$0 sm:$0xff] }
 0xe23   :  { %2948 = vmatprep.subr.mxu1 %v1987_v43 }
 0xe24   :  { %2949 = vmatpush3.msra.mxu1 %v1987_v43 }
 0xe25   :  { %2950 = vmatprep.subr.mxu1 %v1986_v20 }
 0xe26   :  { %2951 = vmatpush3.msra.mxu1 %v1986_v20 }
 0xe27   :  { %2952 = vmatprep.subr.mxu1 %v1985_v44 }
 0xe28   :  { %2953 = vmatpush3.msra.mxu1 %v1985_v44 }
 0xe29   :  { %2954 = vmatprep.subr.mxu1 %v1984_v45 }
 0xe2a   :  { %2955 = vmatpush3.msra.mxu1 %v1984_v45 }
 0xe2b   :  { %2956 = vmatprep.subr.mxu1 %v1983_v46 }
 0xe2c   :  { %2957 = vmatpush3.msra.mxu1 %v1983_v46 }
 0xe2d   :  { %2958 = vmatprep.subr.mxu1 %v1982_v47 }
 0xe2e   :  { %2959 = vmatpush3.msra.mxu1 %v1982_v47  ;;  %v2204_v47 = vld [vmem:[#allocation4 + $0x2b0] sm:$0xff] }
 0xe2f   :  { %2960 = vmatprep.subr.mxu1 %v1981_v6 }
 0xe30   :  { %2961 = vmatpush3.msra.mxu1 %v1981_v6 }
 0xe31   :  { %2962 = vmatprep.subr.mxu1 %v1980_v7 }
 0xe32   :  { %2963 = vmatpush3.msra.mxu1 %v1980_v7 }
 0xe33   :  { %2964 = vmatprep.subr.mxu1 %v1979_v8 }
 0xe34   :  { %2965 = vmatpush3.msra.mxu1 %v1979_v8 }
 0xe35   :  { %2966 = vmatprep.subr.mxu1 %v1978_v9 }
 0xe36   :  { %2967 = vmatpush3.msra.mxu1 %v1978_v9 }
 0xed7   :  { %v2924_v21 = vpop.f32.mrf.mxu1 }
 0xed8   :  { %v1929_v22 = vadd.f32 %v2924_v21, %v2565_v19 }
 0xed9   :  { %v1923_v23 = vpop.f32.mrf.mxu1 }
 0xeda   :  { %v1924_v24 = vadd.f32 %v2565_v19, %v1923_v23  ;;  %v1933_v25 = vadd.f32 %v1929_v22, %v3229_v57 }
 0xedc   :  { %v1939_v26 = vsel %vm152_vm1, %v1933_v25, 0.0  ;;  %v1932_v27 = vadd.f32 %v1924_v24, %v3227_v56 }
 0xedd   :  { %1940 = vadd.xlane.f32.xlu1 %v1939_v26 }
 0xede   :  { %v1936_v28 = vsel %vm152_vm1, %v1932_v27, 0.0 }
 0xedf   :  { %1937 = vadd.xlane.f32.xlu0 %v1936_v28 }
 0xf66   :  { %v1941_v29 = vpop.xlane.xlu1 %1940 }
 0xf67   :  { %v1943_v30 = vmul.f32 0.03125, %v1941_v29 }
 0xf68   :  { %v1938_v31 = vpop.xlane.xlu0 %1937 }
 0xf69   :  { %v3293_v53 = vsub.f32 %v1933_v25, %v1943_v30  ;;  %v1942_v51 = vmul.f32 0.03125, %v1938_v31 }
 0xf6b   :  { %v3295_v62 = vsub.f32 %v1932_v27, %v1942_v51  ;;  %v1947_v32 = vmul.f32 %v3293_v53, %v3293_v53 }
 0xf6d   :  { %v1951_v57 = vsel %vm152_vm1, %v1947_v32, 0.0  ;;  %v1946_v56 = vmul.f32 %v3295_v62, %v3295_v62 }
 0xf6e   :  { %1952 = vadd.xlane.f32.xlu1 %v1951_v57 }
 0xf6f   :  { %v1948_v33 = vsel %vm152_vm1, %v1946_v56, 0.0  ;;  %v3106_v56 = vmov 0.0  }
 0xf70   :  { %1949 = vadd.xlane.f32.xlu0 %v1948_v33  ;;  %2971 = vmatprep.subr.mxu0 %v3106_v56 }
 0xff7   :  { %v1953_v48 = vpop.xlane.xlu1 %1952 }
 0xff8   :  { %v1955_v49 = vmul.f32 0.03125, %v1953_v48  ;;  %v2281_v48 = vld [vmem:[#allocation4 + $0x288] sm:$0xff] }
 0xff9   :  { %v1950_v50 = vpop.xlane.xlu0 %1949 }
 0xffa   :  { %v1957_v52 = vadd.f32 1e-05, %v1955_v49  ;;  %v1954_v54 = vmul.f32 0.03125, %v1950_v50  ;;  %v2280_v49 = vld [vmem:[#allocation4 + $0x280] sm:$0xff]  ;;  %v2279_v50 = vld [vmem:[#allocation4 + $0x278] sm:$0xff] }
 0xffc   :  { %3046 = vrsqrt.f32 %v1957_v52  ;;  %v1956_v55 = vadd.f32 1e-05, %v1954_v54  ;;  %v2278_v52 = vld [vmem:[#allocation4 + $0x270] sm:$0xff] }
 0xffe   :  { %3048 = vrsqrt.f32 %v1956_v55 }
0x1009   :  { %v3047_v58 = vpop.eup %3046 }
0x100a   :  { %v1961_v60 = vmul.f32 %v3047_v58, %v3293_v53  ;;  %v2577_v58 = vld [vmem:[#allocation4 + $0x19] ss:$0 sm:$0xff] }
0x100b   :  { %v3049_v63 = vpop.eup %3048 }
0x100c   :  { %v1960_v0 = vmul.f32 %v3049_v63, %v3295_v62  ;;  %v1967_v1 = vmul.f32 %v2568_v59, %v1961_v60 }
0x100e   :  { %v1966_v3 = vmul.f32 %v2568_v59, %v1960_v0  ;;  %v1973_v5 = vadd.f32 %v2569_v2, %v1967_v1  ;;  %v2580_v0 = vld [vmem:[#allocation4 + $0x2c1] ss:$0 sm:$0xff]  ;;  %v2579_v1 = vld [vmem:[#allocation4 + $0x2c0] ss:$0 sm:$0xff] }
0x1010   :  { %v1972_v4 = vadd.f32 %v2569_v2, %v1966_v3 }
0x1012   :  { %2933 = vmatprep.mubr.msk.f32.mxu0 %vm152_vm1, %v1972_v4 }
0x1013   :  { %2934 = vmatmul.mubr.msk.f32.vlgmr.msra.gmra.mxu0 %vm152_vm1, %v1973_v5 }
0x1014   :  { %2975 = vmatprep.mubr.msk.f32.mxu0 %vm3107_vm2, %v3106_v56 }
0x10d3   :  { %v2935_v11 = vpop.f32.mrf.mxu0 }
0x10d4   :  { %v2077_v61 = vadd.f32 %v2935_v11, %v2570_v10 }
0x10d5   :  { %v2071_v12 = vpop.f32.mrf.mxu0 }
0x10d6   :  { %v2072_v13 = vadd.f32 %v2570_v10, %v2071_v12  ;;  %v2081_v15 = vmax.f32 %v2077_v61, 0.0 }
0x10d8   :  { %v2080_v14 = vmax.f32 %v2072_v13, 0.0 }
0x10da   :  { %2968 = vmatprep.mubr.f32.mxu1 %v2080_v14 }
0x10db   :  { %2969 = vmatmul.mubr.f32.vlgmr.msra.gmra.mxu1 %v2081_v15 }
0x119b   :  { %v2970_v18 = vpop.f32.mrf.mxu1 }
0x119c   :  { %v2159_v19 = vadd.f32 %v2970_v18, %v2573_v16 }
0x119d   :  { %v2153_v21 = vpop.f32.mrf.mxu1 }
0x119e   :  { %v2154_v22 = vadd.f32 %v2573_v16, %v2153_v21  ;;  %v2163_v23 = vadd.f32 %v2159_v19, %v1973_v5  ;;  %v2417_v19 = vld [vmem:[#allocation4 + $0x298] sm:$0xff]  ;;  %v2416_v21 = vld [vmem:[#allocation4 + $0x290] sm:$0xff] }
0x11a0   :  { %v2169_v24 = vsel %vm152_vm1, %v2163_v23, 0.0  ;;  %v2162_v25 = vadd.f32 %v2154_v22, %v1972_v4 }
0x11a1   :  { %2170 = vadd.xlane.f32.xlu0 %v2169_v24 }
0x11a2   :  { %v2166_v26 = vsel %vm152_vm1, %v2162_v25, 0.0 }
0x11a3   :  { %2167 = vadd.xlane.f32.xlu1 %v2166_v26 }
0x122a   :  { %v2171_v27 = vpop.xlane.xlu0 %2170 }
0x122b   :  { %v2173_v28 = vmul.f32 0.03125, %v2171_v27 }
0x122c   :  { %v2168_v29 = vpop.xlane.xlu1 %2167 }
0x122d   :  { %v2175_v30 = vsub.f32 %v2163_v23, %v2173_v28  ;;  %v2172_v31 = vmul.f32 0.03125, %v2168_v29 }
0x122f   :  { %v2174_v53 = vsub.f32 %v2162_v25, %v2172_v31  ;;  %v2177_v51 = vmul.f32 %v2175_v30, %v2175_v30 }
0x1231   :  { %v2181_v62 = vsel %vm152_vm1, %v2177_v51, 0.0  ;;  %v2176_v32 = vmul.f32 %v2174_v53, %v2174_v53 }
0x1232   :  { %2182 = vadd.xlane.f32.xlu0 %v2181_v62  ;;  %v2581_v62 = vld [vmem:[#allocation4 + $0x1a] ss:$0 sm:$0xff] }
0x1233   :  { %v2178_v57 = vsel %vm152_vm1, %v2176_v32, 0.0 }
0x1234   :  { %2179 = vadd.xlane.f32.xlu1 %v2178_v57  ;;  %v2582_v57 = vld [vmem:[#allocation4 + $0x1b] ss:$0 sm:$0xff] }
0x12bb   :  { %v2183_v33 = vpop.xlane.xlu0 %2182 }
0x12bc   :  { %v2185_v34 = vmul.f32 0.03125, %v2183_v33 }
0x12bd   :  { %v2180_v35 = vpop.xlane.xlu1 %2179 }
0x12be   :  { %v2187_v36 = vadd.f32 1e-05, %v2185_v34  ;;  %v2184_v37 = vmul.f32 0.03125, %v2180_v35  ;;  %v2583_v34 = vld [vmem:[#allocation4 + $0x1c] ss:$0 sm:$0xff] }
0x12c0   :  { %3050 = vrsqrt.f32 %v2187_v36  ;;  %v2186_v38 = vadd.f32 1e-05, %v2184_v37 }
0x12c2   :  { %3052 = vrsqrt.f32 %v2186_v38 }
0x12cd   :  { %v3051_v17 = vpop.eup %3050 }
0x12ce   :  { %v2191_v40 = vmul.f32 %v3051_v17, %v2175_v30 }
0x12cf   :  { %v3053_v41 = vpop.eup %3052 }
0x12d0   :  { %v2197_v43 = vmul.f32 %v2574_v39, %v2191_v40  ;;  %v2190_v20 = vmul.f32 %v3053_v41, %v2174_v53 }
0x12d2   :  { %v2203_v44 = vadd.f32 %v2575_v42, %v2197_v43  ;;  %v2196_v45 = vmul.f32 %v2574_v39, %v2190_v20 }
0x12d4   :  { %2972 = vmatpush3.msra.mxu0 %v2203_v44  ;;  %v2202_v46 = vadd.f32 %v2575_v42, %v2196_v45 }
0x12d5   :  { %2973 = vmatprep.subr.mxu0 %v3106_v56 }
0x12d6   :  { %2974 = vmatpush3.msra.mxu0 %v2202_v46 }
0x12d7   :  { %2976 = vmatmul.mubr.msk.f32.vlgmr.msra.gmra.mxu0 %vm66_vm0, %v2204_v47  ;;  %2978 = vmatprep.subr.mxu0 %v3106_v56 }
0x12d8   :  { %2979 = vmatpush3.msra.mxu0 %v2281_v48  ;;  %2986 = vmatprep.mubr.msk.f32.mxu0 %vm3107_vm2, %v3106_v56 }
0x12d9   :  { %2980 = vmatprep.subr.mxu0 %v3106_v56 }
0x12da   :  { %2981 = vmatpush3.msra.mxu0 %v2280_v49 }
0x12db   :  { %2982 = vmatprep.subr.mxu0 %v3106_v56 }
0x12dc   :  { %2983 = vmatpush3.msra.mxu0 %v2279_v50 }
0x12dd   :  { %2984 = vmatprep.subr.mxu0 %v3106_v56 }
0x12de   :  { %2985 = vmatpush3.msra.mxu0 %v2278_v52 }
0x12df   :  { %2989 = vmatprep.subr.mxu0 %v3106_v56 }
0x1397   :  { %v2274_v54 = vpop.f32.mrf.mxu0 }
0x1398   :  { %2987 = vmatmul.mubr.msk.f32.vlgmr.msra.gmra.mxu0 %vm152_vm1, %v2274_v54 }
0x1399   :  { %v2977_v55 = vpop.f32.mrf.mxu0  ;;  %2993 = vmatprep.mubr.msk.f32.mxu0 %vm3107_vm2, %v3106_v56  ;;  %2990 = vmatpush3.msra.mxu0 %v2417_v19 }
0x139a   :  { %2991 = vmatprep.subr.mxu0 %v3106_v56 }
0x139b   :  { %2992 = vmatpush3.msra.mxu0 %v2416_v21 }
0x1458   :  { %v2356_v59 = vpop.f32.mrf.mxu0 }
0x1459   :  { %v2357_v60 = vadd.f32 %v2577_v58, %v2356_v59 }
0x145a   :  { %v2988_v63 = vpop.f32.mrf.mxu0 }
0x145b   :  { %v2360_v2 = vmax.f32 %v2357_v60, 0.0 }
0x145d   :  { %v2387_v3 = vmul.f32 %v2580_v0, %v2360_v2  ;;  %v2367_v4 = vmul.f32 %v2579_v1, %v2360_v2 }
0x145f   :  { %v2388_v5 = vsel %vm66_vm0, %v2387_v3, 0.0  ;;  %v2368_v6 = vsel %vm66_vm0, %v2367_v4, 0.0 }
0x1460   :  { %2389 = vadd.xlane.f32.xlu1 %v2388_v5  ;;  %2369 = vadd.xlane.f32.xlu0 %v2368_v6 }
0x14e9   :  { %v2390_v7 = vpop.xlane.xlu1 %2389  ;;  %v2370_v8 = vpop.xlane.xlu0 %2369 }
0x14ea   :  { %v2391_v9 = vmul.f32 0.125, %v2390_v7  ;;  %v2371_v10 = vmul.f32 0.125, %v2370_v8 }
0x14ec   :  { %v2392_v11 = vsub.f32 %v2360_v2, %v2391_v9  ;;  %v2372_v61 = vsub.f32 %v2360_v2, %v2371_v10 }
0x14ee   :  { %v2393_v12 = vmul.f32 %v2392_v11, %v2392_v11  ;;  %v2373_v13 = vmul.f32 %v2372_v61, %v2372_v61 }
0x14f0   :  { %v2394_v14 = vmul.f32 %v2580_v0, %v2393_v12  ;;  %v2374_v15 = vmul.f32 %v2579_v1, %v2373_v13 }
0x14f2   :  { %v2395_v16 = vsel %vm66_vm0, %v2394_v14, 0.0  ;;  %v2375_v18 = vsel %vm66_vm0, %v2374_v15, 0.0 }
0x14f3   :  { %2396 = vadd.xlane.f32.xlu1 %v2395_v16  ;;  %2376 = vadd.xlane.f32.xlu0 %v2375_v18 }
0x157c   :  { %v2397_v22 = vpop.xlane.xlu1 %2396  ;;  %v2377_v23 = vpop.xlane.xlu0 %2376 }
0x157d   :  { %v2398_v24 = vmul.f32 0.125, %v2397_v22  ;;  %v2378_v25 = vmul.f32 0.125, %v2377_v23 }
0x157f   :  { %v2399_v26 = vadd.f32 1e-05, %v2398_v24  ;;  %v2379_v27 = vadd.f32 1e-05, %v2378_v25 }
0x1581   :  { %3054 = vrsqrt.f32 %v2399_v26 }
0x1582   :  { %3056 = vrsqrt.f32 %v2379_v27 }
0x158e   :  { %v3055_v28 = vpop.eup %3054 }
0x158f   :  { %v3057_v29 = vpop.eup %3056  ;;  %v2401_v30 = vmul.f32 %v3055_v28, %v2392_v11 }
0x1590   :  { %v2381_v31 = vmul.f32 %v3057_v29, %v2372_v61 }
0x1591   :  { %v2402_v53 = vmul.f32 %v2580_v0, %v2401_v30 }
0x1592   :  { %v2382_v51 = vmul.f32 %v2579_v1, %v2381_v31 }
0x1594   :  { %v2403_v32 = vadd.f32 %v2402_v53, %v2382_v51 }
0x1596   :  { %v2409_v33 = vmul.f32 %v2581_v62, %v2403_v32 }
0x1598   :  { %v2415_v56 = vadd.f32 %v2582_v57, %v2409_v33 }
0x159a   :  { %2994 = vmatmul.mubr.msk.f32.vlgmr.msra.gmra.mxu0 %vm66_vm0, %v2415_v56 }
0x165a   :  { %v2492_v35 = vpop.f32.mrf.mxu0 }
0x165b   :  { %v2493_v36 = vadd.f32 %v2583_v34, %v2492_v35 }
0x165c   :  { %v2995_v37 = vpop.f32.mrf.mxu0 }
0x165d   :  { %2496 = vst [vmem:[%s3337_s2] sm:$0xff] %v2493_v36 }
0x165e   :  { %2501 = vsyncpa [#allocation3], 1 }
0x165f   :  { %2502 = vsyncpa [#allocation5], 1 }

</bundles_post_ra>
